<compile_context>
chip_gen: v7x
topology: tpu7x:2x2x1
jax: 0.10.0
libtpu: 0.0.40
codegen_flags: <defaults>
</compile_context>

<pallas_src>
import jax
import jax.numpy as jnp
from jax import lax
from jax.experimental import pallas as pl
from jax.experimental.pallas import tpu as pltpu  # noqa: F401  (kept for parity)

# ----------------------------- model dimensions -----------------------------
B = 2          # batch
S = 8          # sequence length
D = 32         # d_model
H = 4          # num heads
DH = 8         # d_kv  (H * DH == D)
HDH = H * DH   # 32
DFF = 64       # d_ff
VOCAB = 64     # synthetic vocab
LABEL_DIM = 5
N_LAYERS = 2
CLS_HID = 256  # classifier hidden width (nn.Linear(d_model+label_dim, 256))
BN_EPS = 1e-5  # nn.BatchNorm1d default
LN_EPS = 1e-6  # T5 LayerNorm (RMSNorm) default
NEG_INF = -1e30
N = B * S      # total token rows


# ------------------------------ fused kernel --------------------------------
def _rms(x, w):
    """T5 LayerNorm: RMS norm, no mean subtraction, no bias."""
    var = jnp.mean(x * x, axis=-1, keepdims=True)
    return x * lax.rsqrt(var + LN_EPS) * w


def _disc_kernel(ids_ref, lab_ref, bias_ref, pool_ref, hmask_ref, embed_ref,
                 ln1_ref, wqkv_ref, wo_ref, ln2_ref, wi_ref, woff_ref,
                 fln_ref,
                 wp_ref, bp_ref, g1_ref, be1_ref,
                 w1a_ref, w1b_ref, b1_ref, g2_ref, be2_ref,
                 w2_ref, b2_ref,
                 o_ref):
    f32 = jnp.float32

    # --- embedding lookup as one-hot matmul (table is VMEM resident) ---
    ids = ids_ref[...]                                              # (N, 1) int32
    vocab_iota = lax.broadcasted_iota(jnp.int32, (N, VOCAB), 1)
    onehot = jnp.where(vocab_iota == ids, 1.0, 0.0).astype(f32)     # (N, VOCAB)
    x = jnp.dot(onehot, embed_ref[...], preferred_element_type=f32)  # (N, D)

    attn_bias = bias_ref[...]                                       # (N, N) block-diag bias

    # --- encoder layers (static unroll; fine at N_LAYERS=2) ---
    for l in range(N_LAYERS):
        # self-attention block
        h = _rms(x, ln1_ref[l])                                     # (N, D)
        qkv = jnp.dot(h, wqkv_ref[l], preferred_element_type=f32)   # (N, 3*HDH)
        q_all = qkv[:, :HDH]                                        # (N, HDH)
        k_all = qkv[:, HDH:2 * HDH]                                 # (N, HDH)
        v_all = qkv[:, 2 * HDH:3 * HDH]                             # (N, HDH)

        ctx = None                                                  # (N, HDH) head-concat by masked accumulation
        for hd in range(H):
            mask = hmask_ref[hd]                                    # (N, HDH) 0/1 constant
            # Masked Q contracted against full K == Q_h @ K_h^T exactly
            # (masked-out lanes contribute exact zeros).  dot_general with
            # contracting dims (1,1) lets Mosaic handle the transposed
            # operand (no explicit XLU vxpose).
            s = lax.dot_general(q_all * mask, k_all,
                                dimension_numbers=(((1,), (1,)), ((), ())),
                                preferred_element_type=f32)         # (N, N)
            # T5 attention is NOT scaled by 1/sqrt(d_k); block-diagonal bias
            # keeps the batch elements independent.
            s = s + attn_bias
            s = s - jnp.max(s, axis=-1, keepdims=True)
            p = jnp.exp(s)
            denom = jnp.sum(p, axis=-1, keepdims=True)
            p = p * pl.reciprocal(denom, approx=True)               # EUP recip + VPU mul
            term = jnp.dot(p, v_all * mask, preferred_element_type=f32)  # (N, HDH)
            ctx = term if ctx is None else ctx + term
        x = x + jnp.dot(ctx, wo_ref[l], preferred_element_type=f32)

        # feed-forward block (dense-relu-dense)
        h2 = _rms(x, ln2_ref[l])
        ff = jnp.maximum(jnp.dot(h2, wi_ref[l], preferred_element_type=f32), 0.0)
        x = x + jnp.dot(ff, woff_ref[l], preferred_element_type=f32)

    # --- final RMSNorm -> last_hidden_state (N, D) ---
    x = _rms(x, fln_ref[...])

    # --- mean pool over sequence (dim=1) via constant pooling matmul ---
    pooled = jnp.dot(pool_ref[...], x, preferred_element_type=f32)  # (B, D)

    # --- embedding_projector: Linear(D, D) + BatchNorm1d(D) (batch stats) ---
    emb = jnp.dot(pooled, wp_ref[...], preferred_element_type=f32) + bp_ref[...]
    mu = jnp.mean(emb, axis=0, keepdims=True)
    var = jnp.mean((emb - mu) ** 2, axis=0, keepdims=True)          # biased var
    emb = (emb - mu) * lax.rsqrt(var + BN_EPS) * g1_ref[...] + be1_ref[...]

    # --- classifier: Linear(D+L, 256) on cat([emb, labels]) == emb@Wa + labels@Wb ---
    z = (jnp.dot(emb, w1a_ref[...], preferred_element_type=f32)
         + jnp.dot(lab_ref[...], w1b_ref[...], preferred_element_type=f32)
         + b1_ref[...])
    mu2 = jnp.mean(z, axis=0, keepdims=True)
    var2 = jnp.mean((z - mu2) ** 2, axis=0, keepdims=True)
    z = (z - mu2) * lax.rsqrt(var2 + BN_EPS) * g2_ref[...] + be2_ref[...]
    z = jnp.where(z >= 0.0, z, 0.2 * z)                             # LeakyReLU(0.2)

    # final Linear(256, 1) as VPU multiply + lane reduction (avoid N=1 MXU push)
    o_ref[...] = jnp.sum(z * w2_ref[...], axis=-1, keepdims=True) + b2_ref[...]


def discriminator_pallas(text_ids, labels, params):
    ids_col = text_ids.reshape(N, 1).astype(jnp.int32)

    # Trace-time constants (folded under jit; a few KiB DMA'd once with weights).
    tok_batch = jnp.arange(N, dtype=jnp.int32) // S
    attn_bias = jnp.where(tok_batch[:, None] == tok_batch[None, :],
                          0.0, NEG_INF).astype(jnp.float32)          # (N, N)
    pool = (jnp.arange(B, dtype=jnp.int32)[:, None]
            == tok_batch[None, :]).astype(jnp.float32) / S           # (B, N)
    lane = jnp.arange(HDH, dtype=jnp.int32)
    hmask = (lane[None, :] // DH
             == jnp.arange(H, dtype=jnp.int32)[:, None]).astype(jnp.float32)
    hmask = jnp.broadcast_to(hmask[:, None, :], (H, N, HDH))         # (H, N, HDH)

    h = params["head"]
    return pl.pallas_call(
        _disc_kernel,
        out_shape=jax.ShapeDtypeStruct((B, 1), jnp.float32),
    )(ids_col, labels, attn_bias, pool, hmask, params["embed"],
      params["ln1"], params["wqkv"], params["wo"],
      params["ln2"], params["wi"], params["wo_ff"],
      params["final_ln"],
      h["wp"], h["bp"], h["g1"], h["be1"],
      h["w1a"], h["w1b"], h["b1"], h["g2"], h["be2"],
      h["w2"], h["b2"])


@jax.jit
def discriminator_forward(text_ids, labels, params):
    return discriminator_pallas(text_ids, labels, params)


# ----------------------------- parameter init -------------------------------
def init_params(key):
    ks = iter(jax.random.split(key, 32))
    nrm = lambda shape, scale=0.02: (
        scale * jax.random.normal(next(ks), shape)).astype(jnp.float32)

    params = dict(
        embed=nrm((VOCAB, D), scale=1.0),
        # stacked per-layer encoder weights
        ln1=jnp.ones((N_LAYERS, 1, D), jnp.float32),
        wqkv=nrm((N_LAYERS, D, 3 * HDH)),          # fused Q|K|V projection
        wo=nrm((N_LAYERS, HDH, D)),
        ln2=jnp.ones((N_LAYERS, 1, D), jnp.float32),
        wi=nrm((N_LAYERS, D, DFF)),
        wo_ff=nrm((N_LAYERS, DFF, D)),
        final_ln=jnp.ones((1, D), jnp.float32),
        head=dict(
            wp=nrm((D, D)), bp=jnp.zeros((1, D), jnp.float32),
            g1=jnp.ones((1, D), jnp.float32), be1=jnp.zeros((1, D), jnp.float32),
            w1a=nrm((D, CLS_HID)), w1b=nrm((LABEL_DIM, CLS_HID)),
            b1=jnp.zeros((1, CLS_HID), jnp.float32),
            g2=jnp.ones((1, CLS_HID), jnp.float32),
            be2=jnp.zeros((1, CLS_HID), jnp.float32),
            w2=nrm((1, CLS_HID)),                  # used as a row vector (VPU reduce)
            b2=jnp.zeros((1, 1), jnp.float32),
        ),
    )
    return params


# ----------------------------------- main ------------------------------------
if __name__ == "__main__":
    key = jax.random.PRNGKey(0)
    k_param, k_text, k_lab = jax.random.split(key, 3)

    params = init_params(k_param)
    text = jax.random.randint(k_text, (B, S), 0, VOCAB, dtype=jnp.int32)
    labels = jax.nn.one_hot(
        jax.random.randint(k_lab, (B,), 0, LABEL_DIM), LABEL_DIM
    ).astype(jnp.float32)                          # (B, LABEL_DIM)

    out = discriminator_forward(text, labels, params)
    jax.block_until_ready(out)
    assert out.shape == (B, 1) and out.dtype == jnp.float32
    assert bool(jnp.all(jnp.isfinite(out)))
    print("KERNEL_OK")
</pallas_src>

<mosaic_0001>
module attributes {stable_mosaic.version = 11 : i64} {
  func.func @_disc_kernel(%arg0: memref<16x1xi32, #tpu.memory_space<vmem>>, %arg1: memref<2x5xf32, #tpu.memory_space<vmem>>, %arg2: memref<16x16xf32, #tpu.memory_space<vmem>>, %arg3: memref<2x16xf32, #tpu.memory_space<vmem>>, %arg4: memref<4x16x32xf32, #tpu.memory_space<vmem>>, %arg5: memref<64x32xf32, #tpu.memory_space<vmem>>, %arg6: memref<2x1x32xf32, #tpu.memory_space<vmem>>, %arg7: memref<2x32x96xf32, #tpu.memory_space<vmem>>, %arg8: memref<2x32x32xf32, #tpu.memory_space<vmem>>, %arg9: memref<2x1x32xf32, #tpu.memory_space<vmem>>, %arg10: memref<2x32x64xf32, #tpu.memory_space<vmem>>, %arg11: memref<2x64x32xf32, #tpu.memory_space<vmem>>, %arg12: memref<1x32xf32, #tpu.memory_space<vmem>>, %arg13: memref<32x32xf32, #tpu.memory_space<vmem>>, %arg14: memref<1x32xf32, #tpu.memory_space<vmem>>, %arg15: memref<1x32xf32, #tpu.memory_space<vmem>>, %arg16: memref<1x32xf32, #tpu.memory_space<vmem>>, %arg17: memref<32x256xf32, #tpu.memory_space<vmem>>, %arg18: memref<5x256xf32, #tpu.memory_space<vmem>>, %arg19: memref<1x256xf32, #tpu.memory_space<vmem>>, %arg20: memref<1x256xf32, #tpu.memory_space<vmem>>, %arg21: memref<1x256xf32, #tpu.memory_space<vmem>>, %arg22: memref<1x256xf32, #tpu.memory_space<vmem>>, %arg23: memref<1x1xf32, #tpu.memory_space<vmem>>, %arg24: memref<2x1xf32, #tpu.memory_space<vmem>>) attributes {dimension_semantics = [], scalar_prefetch = 0 : i64, scratch_operands = 0 : i64, tpu.core_type = #tpu.core_type<tc>} {
    %c0 = arith.constant 0 : index
    %c0_0 = arith.constant 0 : index
    %0 = vector.load %arg0[%c0, %c0_0] : memref<16x1xi32, #tpu.memory_space<vmem>>, vector<16x1xi32>
    %1 = tpu.iota {dimensions = array<i32: 1>} : vector<16x64xi32>
    %2 = vector.broadcast %0 : vector<16x1xi32> to vector<16x64xi32>
    %3 = arith.cmpi eq, %1, %2 : vector<16x64xi32>
    %cst = arith.constant 1.000000e+00 : f32
    %cst_1 = arith.constant 0.000000e+00 : f32
    %4 = vector.broadcast %cst : f32 to vector<16x64xf32>
    %5 = vector.broadcast %cst_1 : f32 to vector<16x64xf32>
    %6 = arith.select %3, %4, %5 : vector<16x64xi1>, vector<16x64xf32>
    %c0_2 = arith.constant 0 : index
    %c0_3 = arith.constant 0 : index
    %7 = vector.load %arg5[%c0_2, %c0_3] : memref<64x32xf32, #tpu.memory_space<vmem>>, vector<64x32xf32>
    %cst_4 = arith.constant dense<0.000000e+00> : vector<16x32xf32>
    %8 = tpu.matmul %6, %7, %cst_4 {dimension_numbers = #tpu.dot_dimension_numbers<[1], [0], [0], [1], [0, 0, 1, 1], [], []>} : vector<16x64xf32>, vector<64x32xf32>, vector<16x32xf32> -> vector<16x32xf32>
    %c0_5 = arith.constant 0 : index
    %c0_6 = arith.constant 0 : index
    %9 = vector.load %arg2[%c0_5, %c0_6] : memref<16x16xf32, #tpu.memory_space<vmem>>, vector<16x16xf32>
    %c0_7 = arith.constant 0 : index
    %c0_8 = arith.constant 0 : index
    %c0_9 = arith.constant 0 : index
    %10 = vector.load %arg6[%c0_7, %c0_8, %c0_9] : memref<2x1x32xf32, #tpu.memory_space<vmem>>, vector<1x1x32xf32>
    %11 = vector.shape_cast %10 : vector<1x1x32xf32> to vector<1x32xf32>
    %12 = arith.mulf %8, %8 : vector<16x32xf32>
    %cst_10 = arith.constant dense<0.000000e+00> : vector<16xf32>
    %13 = vector.multi_reduction <add>, %12, %cst_10 [1] : vector<16x32xf32> to vector<16xf32>
    %14 = vector.shape_cast %13 : vector<16xf32> to vector<16x1xf32>
    %cst_11 = arith.constant 3.200000e+01 : f32
    %15 = vector.broadcast %cst_11 : f32 to vector<16x1xf32>
    %16 = arith.divf %14, %15 : vector<16x1xf32>
    %cst_12 = arith.constant 9.99999997E-7 : f32
    %17 = vector.broadcast %cst_12 : f32 to vector<16x1xf32>
    %18 = arith.addf %16, %17 : vector<16x1xf32>
    %19 = math.rsqrt %18 : vector<16x1xf32>
    %20 = vector.broadcast %19 : vector<16x1xf32> to vector<16x32xf32>
    %21 = arith.mulf %8, %20 : vector<16x32xf32>
    %22 = vector.broadcast %11 : vector<1x32xf32> to vector<16x32xf32>
    %23 = arith.mulf %21, %22 : vector<16x32xf32>
    %c0_13 = arith.constant 0 : index
    %c0_14 = arith.constant 0 : index
    %c0_15 = arith.constant 0 : index
    %24 = vector.load %arg7[%c0_13, %c0_14, %c0_15] : memref<2x32x96xf32, #tpu.memory_space<vmem>>, vector<1x32x96xf32>
    %25 = vector.shape_cast %24 : vector<1x32x96xf32> to vector<32x96xf32>
    %cst_16 = arith.constant dense<0.000000e+00> : vector<16x96xf32>
    %26 = tpu.matmul %23, %25, %cst_16 {dimension_numbers = #tpu.dot_dimension_numbers<[1], [0], [0], [1], [0, 0, 1, 1], [], []>} : vector<16x32xf32>, vector<32x96xf32>, vector<16x96xf32> -> vector<16x96xf32>
    %27 = vector.extract_strided_slice %26 {offsets = [0, 0], sizes = [16, 32], strides = [1, 1]} : vector<16x96xf32> to vector<16x32xf32>
    %28 = vector.extract_strided_slice %26 {offsets = [0, 32], sizes = [16, 32], strides = [1, 1]} : vector<16x96xf32> to vector<16x32xf32>
    %29 = vector.extract_strided_slice %26 {offsets = [0, 64], sizes = [16, 32], strides = [1, 1]} : vector<16x96xf32> to vector<16x32xf32>
    %c0_17 = arith.constant 0 : index
    %c0_18 = arith.constant 0 : index
    %c0_19 = arith.constant 0 : index
    %30 = vector.load %arg4[%c0_17, %c0_18, %c0_19] : memref<4x16x32xf32, #tpu.memory_space<vmem>>, vector<1x16x32xf32>
    %31 = vector.shape_cast %30 : vector<1x16x32xf32> to vector<16x32xf32>
    %32 = arith.mulf %27, %31 : vector<16x32xf32>
    %cst_20 = arith.constant dense<0.000000e+00> : vector<16x16xf32>
    %33 = tpu.matmul %32, %28, %cst_20 {dimension_numbers = #tpu.dot_dimension_numbers<[1], [1], [0], [0], [0, 0, 1, 0], [], []>} : vector<16x32xf32>, vector<16x32xf32>, vector<16x16xf32> -> vector<16x16xf32>
    %34 = arith.addf %33, %9 : vector<16x16xf32>
    %cst_21 = arith.constant dense<0xFF800000> : vector<16xf32>
    %35 = vector.multi_reduction <maximumf>, %34, %cst_21 [1] : vector<16x16xf32> to vector<16xf32>
    %36 = vector.shape_cast %35 : vector<16xf32> to vector<16x1xf32>
    %37 = vector.broadcast %36 : vector<16x1xf32> to vector<16x16xf32>
    %38 = arith.subf %34, %37 : vector<16x16xf32>
    %39 = math.exp %38 : vector<16x16xf32>
    %cst_22 = arith.constant dense<0.000000e+00> : vector<16xf32>
    %40 = vector.multi_reduction <add>, %39, %cst_22 [1] : vector<16x16xf32> to vector<16xf32>
    %41 = vector.shape_cast %40 : vector<16xf32> to vector<16x1xf32>
    %42 = tpu.reciprocal %41 {approx = true} : vector<16x1xf32> -> vector<16x1xf32>
    %43 = vector.broadcast %42 : vector<16x1xf32> to vector<16x16xf32>
    %44 = arith.mulf %39, %43 : vector<16x16xf32>
    %45 = arith.mulf %29, %31 : vector<16x32xf32>
    %cst_23 = arith.constant dense<0.000000e+00> : vector<16x32xf32>
    %46 = tpu.matmul %44, %45, %cst_23 {dimension_numbers = #tpu.dot_dimension_numbers<[1], [0], [0], [1], [0, 0, 1, 1], [], []>} : vector<16x16xf32>, vector<16x32xf32>, vector<16x32xf32> -> vector<16x32xf32>
    %c1 = arith.constant 1 : index
    %c0_24 = arith.constant 0 : index
    %c0_25 = arith.constant 0 : index
    %47 = vector.load %arg4[%c1, %c0_24, %c0_25] : memref<4x16x32xf32, #tpu.memory_space<vmem>>, vector<1x16x32xf32>
    %48 = vector.shape_cast %47 : vector<1x16x32xf32> to vector<16x32xf32>
    %49 = arith.mulf %27, %48 : vector<16x32xf32>
    %cst_26 = arith.constant dense<0.000000e+00> : vector<16x16xf32>
    %50 = tpu.matmul %49, %28, %cst_26 {dimension_numbers = #tpu.dot_dimension_numbers<[1], [1], [0], [0], [0, 0, 1, 0], [], []>} : vector<16x32xf32>, vector<16x32xf32>, vector<16x16xf32> -> vector<16x16xf32>
    %51 = arith.addf %50, %9 : vector<16x16xf32>
    %cst_27 = arith.constant dense<0xFF800000> : vector<16xf32>
    %52 = vector.multi_reduction <maximumf>, %51, %cst_27 [1] : vector<16x16xf32> to vector<16xf32>
    %53 = vector.shape_cast %52 : vector<16xf32> to vector<16x1xf32>
    %54 = vector.broadcast %53 : vector<16x1xf32> to vector<16x16xf32>
    %55 = arith.subf %51, %54 : vector<16x16xf32>
    %56 = math.exp %55 : vector<16x16xf32>
    %cst_28 = arith.constant dense<0.000000e+00> : vector<16xf32>
    %57 = vector.multi_reduction <add>, %56, %cst_28 [1] : vector<16x16xf32> to vector<16xf32>
    %58 = vector.shape_cast %57 : vector<16xf32> to vector<16x1xf32>
    %59 = tpu.reciprocal %58 {approx = true} : vector<16x1xf32> -> vector<16x1xf32>
    %60 = vector.broadcast %59 : vector<16x1xf32> to vector<16x16xf32>
    %61 = arith.mulf %56, %60 : vector<16x16xf32>
    %62 = arith.mulf %29, %48 : vector<16x32xf32>
    %cst_29 = arith.constant dense<0.000000e+00> : vector<16x32xf32>
    %63 = tpu.matmul %61, %62, %cst_29 {dimension_numbers = #tpu.dot_dimension_numbers<[1], [0], [0], [1], [0, 0, 1, 1], [], []>} : vector<16x16xf32>, vector<16x32xf32>, vector<16x32xf32> -> vector<16x32xf32>
    %64 = arith.addf %46, %63 : vector<16x32xf32>
    %c2 = arith.constant 2 : index
    %c0_30 = arith.constant 0 : index
    %c0_31 = arith.constant 0 : index
    %65 = vector.load %arg4[%c2, %c0_30, %c0_31] : memref<4x16x32xf32, #tpu.memory_space<vmem>>, vector<1x16x32xf32>
    %66 = vector.shape_cast %65 : vector<1x16x32xf32> to vector<16x32xf32>
    %67 = arith.mulf %27, %66 : vector<16x32xf32>
    %cst_32 = arith.constant dense<0.000000e+00> : vector<16x16xf32>
    %68 = tpu.matmul %67, %28, %cst_32 {dimension_numbers = #tpu.dot_dimension_numbers<[1], [1], [0], [0], [0, 0, 1, 0], [], []>} : vector<16x32xf32>, vector<16x32xf32>, vector<16x16xf32> -> vector<16x16xf32>
    %69 = arith.addf %68, %9 : vector<16x16xf32>
    %cst_33 = arith.constant dense<0xFF800000> : vector<16xf32>
    %70 = vector.multi_reduction <maximumf>, %69, %cst_33 [1] : vector<16x16xf32> to vector<16xf32>
    %71 = vector.shape_cast %70 : vector<16xf32> to vector<16x1xf32>
    %72 = vector.broadcast %71 : vector<16x1xf32> to vector<16x16xf32>
    %73 = arith.subf %69, %72 : vector<16x16xf32>
    %74 = math.exp %73 : vector<16x16xf32>
    %cst_34 = arith.constant dense<0.000000e+00> : vector<16xf32>
    %75 = vector.multi_reduction <add>, %74, %cst_34 [1] : vector<16x16xf32> to vector<16xf32>
    %76 = vector.shape_cast %75 : vector<16xf32> to vector<16x1xf32>
    %77 = tpu.reciprocal %76 {approx = true} : vector<16x1xf32> -> vector<16x1xf32>
    %78 = vector.broadcast %77 : vector<16x1xf32> to vector<16x16xf32>
    %79 = arith.mulf %74, %78 : vector<16x16xf32>
    %80 = arith.mulf %29, %66 : vector<16x32xf32>
    %cst_35 = arith.constant dense<0.000000e+00> : vector<16x32xf32>
    %81 = tpu.matmul %79, %80, %cst_35 {dimension_numbers = #tpu.dot_dimension_numbers<[1], [0], [0], [1], [0, 0, 1, 1], [], []>} : vector<16x16xf32>, vector<16x32xf32>, vector<16x32xf32> -> vector<16x32xf32>
    %82 = arith.addf %64, %81 : vector<16x32xf32>
    %c3 = arith.constant 3 : index
    %c0_36 = arith.constant 0 : index
    %c0_37 = arith.constant 0 : index
    %83 = vector.load %arg4[%c3, %c0_36, %c0_37] : memref<4x16x32xf32, #tpu.memory_space<vmem>>, vector<1x16x32xf32>
    %84 = vector.shape_cast %83 : vector<1x16x32xf32> to vector<16x32xf32>
    %85 = arith.mulf %27, %84 : vector<16x32xf32>
    %cst_38 = arith.constant dense<0.000000e+00> : vector<16x16xf32>
    %86 = tpu.matmul %85, %28, %cst_38 {dimension_numbers = #tpu.dot_dimension_numbers<[1], [1], [0], [0], [0, 0, 1, 0], [], []>} : vector<16x32xf32>, vector<16x32xf32>, vector<16x16xf32> -> vector<16x16xf32>
    %87 = arith.addf %86, %9 : vector<16x16xf32>
    %cst_39 = arith.constant dense<0xFF800000> : vector<16xf32>
    %88 = vector.multi_reduction <maximumf>, %87, %cst_39 [1] : vector<16x16xf32> to vector<16xf32>
    %89 = vector.shape_cast %88 : vector<16xf32> to vector<16x1xf32>
    %90 = vector.broadcast %89 : vector<16x1xf32> to vector<16x16xf32>
    %91 = arith.subf %87, %90 : vector<16x16xf32>
    %92 = math.exp %91 : vector<16x16xf32>
    %cst_40 = arith.constant dense<0.000000e+00> : vector<16xf32>
    %93 = vector.multi_reduction <add>, %92, %cst_40 [1] : vector<16x16xf32> to vector<16xf32>
    %94 = vector.shape_cast %93 : vector<16xf32> to vector<16x1xf32>
    %95 = tpu.reciprocal %94 {approx = true} : vector<16x1xf32> -> vector<16x1xf32>
    %96 = vector.broadcast %95 : vector<16x1xf32> to vector<16x16xf32>
    %97 = arith.mulf %92, %96 : vector<16x16xf32>
    %98 = arith.mulf %29, %84 : vector<16x32xf32>
    %cst_41 = arith.constant dense<0.000000e+00> : vector<16x32xf32>
    %99 = tpu.matmul %97, %98, %cst_41 {dimension_numbers = #tpu.dot_dimension_numbers<[1], [0], [0], [1], [0, 0, 1, 1], [], []>} : vector<16x16xf32>, vector<16x32xf32>, vector<16x32xf32> -> vector<16x32xf32>
    %100 = arith.addf %82, %99 : vector<16x32xf32>
    %c0_42 = arith.constant 0 : index
    %c0_43 = arith.constant 0 : index
    %c0_44 = arith.constant 0 : index
    %101 = vector.load %arg8[%c0_42, %c0_43, %c0_44] : memref<2x32x32xf32, #tpu.memory_space<vmem>>, vector<1x32x32xf32>
    %102 = vector.shape_cast %101 : vector<1x32x32xf32> to vector<32x32xf32>
    %cst_45 = arith.constant dense<0.000000e+00> : vector<16x32xf32>
    %103 = tpu.matmul %100, %102, %cst_45 {dimension_numbers = #tpu.dot_dimension_numbers<[1], [0], [0], [1], [0, 0, 1, 1], [], []>} : vector<16x32xf32>, vector<32x32xf32>, vector<16x32xf32> -> vector<16x32xf32>
    %104 = arith.addf %8, %103 : vector<16x32xf32>
    %c0_46 = arith.constant 0 : index
    %c0_47 = arith.constant 0 : index
    %c0_48 = arith.constant 0 : index
    %105 = vector.load %arg9[%c0_46, %c0_47, %c0_48] : memref<2x1x32xf32, #tpu.memory_space<vmem>>, vector<1x1x32xf32>
    %106 = vector.shape_cast %105 : vector<1x1x32xf32> to vector<1x32xf32>
    %107 = arith.mulf %104, %104 : vector<16x32xf32>
    %cst_49 = arith.constant dense<0.000000e+00> : vector<16xf32>
    %108 = vector.multi_reduction <add>, %107, %cst_49 [1] : vector<16x32xf32> to vector<16xf32>
    %109 = vector.shape_cast %108 : vector<16xf32> to vector<16x1xf32>
    %cst_50 = arith.constant 3.200000e+01 : f32
    %110 = vector.broadcast %cst_50 : f32 to vector<16x1xf32>
    %111 = arith.divf %109, %110 : vector<16x1xf32>
    %cst_51 = arith.constant 9.99999997E-7 : f32
    %112 = vector.broadcast %cst_51 : f32 to vector<16x1xf32>
    %113 = arith.addf %111, %112 : vector<16x1xf32>
    %114 = math.rsqrt %113 : vector<16x1xf32>
    %115 = vector.broadcast %114 : vector<16x1xf32> to vector<16x32xf32>
    %116 = arith.mulf %104, %115 : vector<16x32xf32>
    %117 = vector.broadcast %106 : vector<1x32xf32> to vector<16x32xf32>
    %118 = arith.mulf %116, %117 : vector<16x32xf32>
    %c0_52 = arith.constant 0 : index
    %c0_53 = arith.constant 0 : index
    %c0_54 = arith.constant 0 : index
    %119 = vector.load %arg10[%c0_52, %c0_53, %c0_54] : memref<2x32x64xf32, #tpu.memory_space<vmem>>, vector<1x32x64xf32>
    %120 = vector.shape_cast %119 : vector<1x32x64xf32> to vector<32x64xf32>
    %cst_55 = arith.constant dense<0.000000e+00> : vector<16x64xf32>
    %121 = tpu.matmul %118, %120, %cst_55 {dimension_numbers = #tpu.dot_dimension_numbers<[1], [0], [0], [1], [0, 0, 1, 1], [], []>} : vector<16x32xf32>, vector<32x64xf32>, vector<16x64xf32> -> vector<16x64xf32>
    %cst_56 = arith.constant 0.000000e+00 : f32
    %122 = vector.broadcast %cst_56 : f32 to vector<16x64xf32>
    %123 = arith.maximumf %121, %122 : vector<16x64xf32>
    %c0_57 = arith.constant 0 : index
    %c0_58 = arith.constant 0 : index
    %c0_59 = arith.constant 0 : index
    %124 = vector.load %arg11[%c0_57, %c0_58, %c0_59] : memref<2x64x32xf32, #tpu.memory_space<vmem>>, vector<1x64x32xf32>
    %125 = vector.shape_cast %124 : vector<1x64x32xf32> to vector<64x32xf32>
    %cst_60 = arith.constant dense<0.000000e+00> : vector<16x32xf32>
    %126 = tpu.matmul %123, %125, %cst_60 {dimension_numbers = #tpu.dot_dimension_numbers<[1], [0], [0], [1], [0, 0, 1, 1], [], []>} : vector<16x64xf32>, vector<64x32xf32>, vector<16x32xf32> -> vector<16x32xf32>
    %127 = arith.addf %104, %126 : vector<16x32xf32>
    %c1_61 = arith.constant 1 : index
    %c0_62 = arith.constant 0 : index
    %c0_63 = arith.constant 0 : index
    %128 = vector.load %arg6[%c1_61, %c0_62, %c0_63] : memref<2x1x32xf32, #tpu.memory_space<vmem>>, vector<1x1x32xf32>
    %129 = vector.shape_cast %128 : vector<1x1x32xf32> to vector<1x32xf32>
    %130 = arith.mulf %127, %127 : vector<16x32xf32>
    %cst_64 = arith.constant dense<0.000000e+00> : vector<16xf32>
    %131 = vector.multi_reduction <add>, %130, %cst_64 [1] : vector<16x32xf32> to vector<16xf32>
    %132 = vector.shape_cast %131 : vector<16xf32> to vector<16x1xf32>
    %cst_65 = arith.constant 3.200000e+01 : f32
    %133 = vector.broadcast %cst_65 : f32 to vector<16x1xf32>
    %134 = arith.divf %132, %133 : vector<16x1xf32>
    %cst_66 = arith.constant 9.99999997E-7 : f32
    %135 = vector.broadcast %cst_66 : f32 to vector<16x1xf32>
    %136 = arith.addf %134, %135 : vector<16x1xf32>
    %137 = math.rsqrt %136 : vector<16x1xf32>
    %138 = vector.broadcast %137 : vector<16x1xf32> to vector<16x32xf32>
    %139 = arith.mulf %127, %138 : vector<16x32xf32>
    %140 = vector.broadcast %129 : vector<1x32xf32> to vector<16x32xf32>
    %141 = arith.mulf %139, %140 : vector<16x32xf32>
    %c1_67 = arith.constant 1 : index
    %c0_68 = arith.constant 0 : index
    %c0_69 = arith.constant 0 : index
    %142 = vector.load %arg7[%c1_67, %c0_68, %c0_69] : memref<2x32x96xf32, #tpu.memory_space<vmem>>, vector<1x32x96xf32>
    %143 = vector.shape_cast %142 : vector<1x32x96xf32> to vector<32x96xf32>
    %cst_70 = arith.constant dense<0.000000e+00> : vector<16x96xf32>
    %144 = tpu.matmul %141, %143, %cst_70 {dimension_numbers = #tpu.dot_dimension_numbers<[1], [0], [0], [1], [0, 0, 1, 1], [], []>} : vector<16x32xf32>, vector<32x96xf32>, vector<16x96xf32> -> vector<16x96xf32>
    %145 = vector.extract_strided_slice %144 {offsets = [0, 0], sizes = [16, 32], strides = [1, 1]} : vector<16x96xf32> to vector<16x32xf32>
    %146 = vector.extract_strided_slice %144 {offsets = [0, 32], sizes = [16, 32], strides = [1, 1]} : vector<16x96xf32> to vector<16x32xf32>
    %147 = vector.extract_strided_slice %144 {offsets = [0, 64], sizes = [16, 32], strides = [1, 1]} : vector<16x96xf32> to vector<16x32xf32>
    %c0_71 = arith.constant 0 : index
    %c0_72 = arith.constant 0 : index
    %c0_73 = arith.constant 0 : index
    %148 = vector.load %arg4[%c0_71, %c0_72, %c0_73] : memref<4x16x32xf32, #tpu.memory_space<vmem>>, vector<1x16x32xf32>
    %149 = vector.shape_cast %148 : vector<1x16x32xf32> to vector<16x32xf32>
    %150 = arith.mulf %145, %149 : vector<16x32xf32>
    %cst_74 = arith.constant dense<0.000000e+00> : vector<16x16xf32>
    %151 = tpu.matmul %150, %146, %cst_74 {dimension_numbers = #tpu.dot_dimension_numbers<[1], [1], [0], [0], [0, 0, 1, 0], [], []>} : vector<16x32xf32>, vector<16x32xf32>, vector<16x16xf32> -> vector<16x16xf32>
    %152 = arith.addf %151, %9 : vector<16x16xf32>
    %cst_75 = arith.constant dense<0xFF800000> : vector<16xf32>
    %153 = vector.multi_reduction <maximumf>, %152, %cst_75 [1] : vector<16x16xf32> to vector<16xf32>
    %154 = vector.shape_cast %153 : vector<16xf32> to vector<16x1xf32>
    %155 = vector.broadcast %154 : vector<16x1xf32> to vector<16x16xf32>
    %156 = arith.subf %152, %155 : vector<16x16xf32>
    %157 = math.exp %156 : vector<16x16xf32>
    %cst_76 = arith.constant dense<0.000000e+00> : vector<16xf32>
    %158 = vector.multi_reduction <add>, %157, %cst_76 [1] : vector<16x16xf32> to vector<16xf32>
    %159 = vector.shape_cast %158 : vector<16xf32> to vector<16x1xf32>
    %160 = tpu.reciprocal %159 {approx = true} : vector<16x1xf32> -> vector<16x1xf32>
    %161 = vector.broadcast %160 : vector<16x1xf32> to vector<16x16xf32>
    %162 = arith.mulf %157, %161 : vector<16x16xf32>
    %163 = arith.mulf %147, %149 : vector<16x32xf32>
    %cst_77 = arith.constant dense<0.000000e+00> : vector<16x32xf32>
    %164 = tpu.matmul %162, %163, %cst_77 {dimension_numbers = #tpu.dot_dimension_numbers<[1], [0], [0], [1], [0, 0, 1, 1], [], []>} : vector<16x16xf32>, vector<16x32xf32>, vector<16x32xf32> -> vector<16x32xf32>
    %c1_78 = arith.constant 1 : index
    %c0_79 = arith.constant 0 : index
    %c0_80 = arith.constant 0 : index
    %165 = vector.load %arg4[%c1_78, %c0_79, %c0_80] : memref<4x16x32xf32, #tpu.memory_space<vmem>>, vector<1x16x32xf32>
    %166 = vector.shape_cast %165 : vector<1x16x32xf32> to vector<16x32xf32>
    %167 = arith.mulf %145, %166 : vector<16x32xf32>
    %cst_81 = arith.constant dense<0.000000e+00> : vector<16x16xf32>
    %168 = tpu.matmul %167, %146, %cst_81 {dimension_numbers = #tpu.dot_dimension_numbers<[1], [1], [0], [0], [0, 0, 1, 0], [], []>} : vector<16x32xf32>, vector<16x32xf32>, vector<16x16xf32> -> vector<16x16xf32>
    %169 = arith.addf %168, %9 : vector<16x16xf32>
    %cst_82 = arith.constant dense<0xFF800000> : vector<16xf32>
    %170 = vector.multi_reduction <maximumf>, %169, %cst_82 [1] : vector<16x16xf32> to vector<16xf32>
    %171 = vector.shape_cast %170 : vector<16xf32> to vector<16x1xf32>
    %172 = vector.broadcast %171 : vector<16x1xf32> to vector<16x16xf32>
    %173 = arith.subf %169, %172 : vector<16x16xf32>
    %174 = math.exp %173 : vector<16x16xf32>
    %cst_83 = arith.constant dense<0.000000e+00> : vector<16xf32>
    %175 = vector.multi_reduction <add>, %174, %cst_83 [1] : vector<16x16xf32> to vector<16xf32>
    %176 = vector.shape_cast %175 : vector<16xf32> to vector<16x1xf32>
    %177 = tpu.reciprocal %176 {approx = true} : vector<16x1xf32> -> vector<16x1xf32>
    %178 = vector.broadcast %177 : vector<16x1xf32> to vector<16x16xf32>
    %179 = arith.mulf %174, %178 : vector<16x16xf32>
    %180 = arith.mulf %147, %166 : vector<16x32xf32>
    %cst_84 = arith.constant dense<0.000000e+00> : vector<16x32xf32>
    %181 = tpu.matmul %179, %180, %cst_84 {dimension_numbers = #tpu.dot_dimension_numbers<[1], [0], [0], [1], [0, 0, 1, 1], [], []>} : vector<16x16xf32>, vector<16x32xf32>, vector<16x32xf32> -> vector<16x32xf32>
    %182 = arith.addf %164, %181 : vector<16x32xf32>
    %c2_85 = arith.constant 2 : index
    %c0_86 = arith.constant 0 : index
    %c0_87 = arith.constant 0 : index
    %183 = vector.load %arg4[%c2_85, %c0_86, %c0_87] : memref<4x16x32xf32, #tpu.memory_space<vmem>>, vector<1x16x32xf32>
    %184 = vector.shape_cast %183 : vector<1x16x32xf32> to vector<16x32xf32>
    %185 = arith.mulf %145, %184 : vector<16x32xf32>
    %cst_88 = arith.constant dense<0.000000e+00> : vector<16x16xf32>
    %186 = tpu.matmul %185, %146, %cst_88 {dimension_numbers = #tpu.dot_dimension_numbers<[1], [1], [0], [0], [0, 0, 1, 0], [], []>} : vector<16x32xf32>, vector<16x32xf32>, vector<16x16xf32> -> vector<16x16xf32>
    %187 = arith.addf %186, %9 : vector<16x16xf32>
    %cst_89 = arith.constant dense<0xFF800000> : vector<16xf32>
    %188 = vector.multi_reduction <maximumf>, %187, %cst_89 [1] : vector<16x16xf32> to vector<16xf32>
    %189 = vector.shape_cast %188 : vector<16xf32> to vector<16x1xf32>
    %190 = vector.broadcast %189 : vector<16x1xf32> to vector<16x16xf32>
    %191 = arith.subf %187, %190 : vector<16x16xf32>
    %192 = math.exp %191 : vector<16x16xf32>
    %cst_90 = arith.constant dense<0.000000e+00> : vector<16xf32>
    %193 = vector.multi_reduction <add>, %192, %cst_90 [1] : vector<16x16xf32> to vector<16xf32>
    %194 = vector.shape_cast %193 : vector<16xf32> to vector<16x1xf32>
    %195 = tpu.reciprocal %194 {approx = true} : vector<16x1xf32> -> vector<16x1xf32>
    %196 = vector.broadcast %195 : vector<16x1xf32> to vector<16x16xf32>
    %197 = arith.mulf %192, %196 : vector<16x16xf32>
    %198 = arith.mulf %147, %184 : vector<16x32xf32>
    %cst_91 = arith.constant dense<0.000000e+00> : vector<16x32xf32>
    %199 = tpu.matmul %197, %198, %cst_91 {dimension_numbers = #tpu.dot_dimension_numbers<[1], [0], [0], [1], [0, 0, 1, 1], [], []>} : vector<16x16xf32>, vector<16x32xf32>, vector<16x32xf32> -> vector<16x32xf32>
    %200 = arith.addf %182, %199 : vector<16x32xf32>
    %c3_92 = arith.constant 3 : index
    %c0_93 = arith.constant 0 : index
    %c0_94 = arith.constant 0 : index
    %201 = vector.load %arg4[%c3_92, %c0_93, %c0_94] : memref<4x16x32xf32, #tpu.memory_space<vmem>>, vector<1x16x32xf32>
    %202 = vector.shape_cast %201 : vector<1x16x32xf32> to vector<16x32xf32>
    %203 = arith.mulf %145, %202 : vector<16x32xf32>
    %cst_95 = arith.constant dense<0.000000e+00> : vector<16x16xf32>
    %204 = tpu.matmul %203, %146, %cst_95 {dimension_numbers = #tpu.dot_dimension_numbers<[1], [1], [0], [0], [0, 0, 1, 0], [], []>} : vector<16x32xf32>, vector<16x32xf32>, vector<16x16xf32> -> vector<16x16xf32>
    %205 = arith.addf %204, %9 : vector<16x16xf32>
    %cst_96 = arith.constant dense<0xFF800000> : vector<16xf32>
    %206 = vector.multi_reduction <maximumf>, %205, %cst_96 [1] : vector<16x16xf32> to vector<16xf32>
    %207 = vector.shape_cast %206 : vector<16xf32> to vector<16x1xf32>
    %208 = vector.broadcast %207 : vector<16x1xf32> to vector<16x16xf32>
    %209 = arith.subf %205, %208 : vector<16x16xf32>
    %210 = math.exp %209 : vector<16x16xf32>
    %cst_97 = arith.constant dense<0.000000e+00> : vector<16xf32>
    %211 = vector.multi_reduction <add>, %210, %cst_97 [1] : vector<16x16xf32> to vector<16xf32>
    %212 = vector.shape_cast %211 : vector<16xf32> to vector<16x1xf32>
    %213 = tpu.reciprocal %212 {approx = true} : vector<16x1xf32> -> vector<16x1xf32>
    %214 = vector.broadcast %213 : vector<16x1xf32> to vector<16x16xf32>
    %215 = arith.mulf %210, %214 : vector<16x16xf32>
    %216 = arith.mulf %147, %202 : vector<16x32xf32>
    %cst_98 = arith.constant dense<0.000000e+00> : vector<16x32xf32>
    %217 = tpu.matmul %215, %216, %cst_98 {dimension_numbers = #tpu.dot_dimension_numbers<[1], [0], [0], [1], [0, 0, 1, 1], [], []>} : vector<16x16xf32>, vector<16x32xf32>, vector<16x32xf32> -> vector<16x32xf32>
    %218 = arith.addf %200, %217 : vector<16x32xf32>
    %c1_99 = arith.constant 1 : index
    %c0_100 = arith.constant 0 : index
    %c0_101 = arith.constant 0 : index
    %219 = vector.load %arg8[%c1_99, %c0_100, %c0_101] : memref<2x32x32xf32, #tpu.memory_space<vmem>>, vector<1x32x32xf32>
    %220 = vector.shape_cast %219 : vector<1x32x32xf32> to vector<32x32xf32>
    %cst_102 = arith.constant dense<0.000000e+00> : vector<16x32xf32>
    %221 = tpu.matmul %218, %220, %cst_102 {dimension_numbers = #tpu.dot_dimension_numbers<[1], [0], [0], [1], [0, 0, 1, 1], [], []>} : vector<16x32xf32>, vector<32x32xf32>, vector<16x32xf32> -> vector<16x32xf32>
    %222 = arith.addf %127, %221 : vector<16x32xf32>
    %c1_103 = arith.constant 1 : index
    %c0_104 = arith.constant 0 : index
    %c0_105 = arith.constant 0 : index
    %223 = vector.load %arg9[%c1_103, %c0_104, %c0_105] : memref<2x1x32xf32, #tpu.memory_space<vmem>>, vector<1x1x32xf32>
    %224 = vector.shape_cast %223 : vector<1x1x32xf32> to vector<1x32xf32>
    %225 = arith.mulf %222, %222 : vector<16x32xf32>
    %cst_106 = arith.constant dense<0.000000e+00> : vector<16xf32>
    %226 = vector.multi_reduction <add>, %225, %cst_106 [1] : vector<16x32xf32> to vector<16xf32>
    %227 = vector.shape_cast %226 : vector<16xf32> to vector<16x1xf32>
    %cst_107 = arith.constant 3.200000e+01 : f32
    %228 = vector.broadcast %cst_107 : f32 to vector<16x1xf32>
    %229 = arith.divf %227, %228 : vector<16x1xf32>
    %cst_108 = arith.constant 9.99999997E-7 : f32
    %230 = vector.broadcast %cst_108 : f32 to vector<16x1xf32>
    %231 = arith.addf %229, %230 : vector<16x1xf32>
    %232 = math.rsqrt %231 : vector<16x1xf32>
    %233 = vector.broadcast %232 : vector<16x1xf32> to vector<16x32xf32>
    %234 = arith.mulf %222, %233 : vector<16x32xf32>
    %235 = vector.broadcast %224 : vector<1x32xf32> to vector<16x32xf32>
    %236 = arith.mulf %234, %235 : vector<16x32xf32>
    %c1_109 = arith.constant 1 : index
    %c0_110 = arith.constant 0 : index
    %c0_111 = arith.constant 0 : index
    %237 = vector.load %arg10[%c1_109, %c0_110, %c0_111] : memref<2x32x64xf32, #tpu.memory_space<vmem>>, vector<1x32x64xf32>
    %238 = vector.shape_cast %237 : vector<1x32x64xf32> to vector<32x64xf32>
    %cst_112 = arith.constant dense<0.000000e+00> : vector<16x64xf32>
    %239 = tpu.matmul %236, %238, %cst_112 {dimension_numbers = #tpu.dot_dimension_numbers<[1], [0], [0], [1], [0, 0, 1, 1], [], []>} : vector<16x32xf32>, vector<32x64xf32>, vector<16x64xf32> -> vector<16x64xf32>
    %cst_113 = arith.constant 0.000000e+00 : f32
    %240 = vector.broadcast %cst_113 : f32 to vector<16x64xf32>
    %241 = arith.maximumf %239, %240 : vector<16x64xf32>
    %c1_114 = arith.constant 1 : index
    %c0_115 = arith.constant 0 : index
    %c0_116 = arith.constant 0 : index
    %242 = vector.load %arg11[%c1_114, %c0_115, %c0_116] : memref<2x64x32xf32, #tpu.memory_space<vmem>>, vector<1x64x32xf32>
    %243 = vector.shape_cast %242 : vector<1x64x32xf32> to vector<64x32xf32>
    %cst_117 = arith.constant dense<0.000000e+00> : vector<16x32xf32>
    %244 = tpu.matmul %241, %243, %cst_117 {dimension_numbers = #tpu.dot_dimension_numbers<[1], [0], [0], [1], [0, 0, 1, 1], [], []>} : vector<16x64xf32>, vector<64x32xf32>, vector<16x32xf32> -> vector<16x32xf32>
    %245 = arith.addf %222, %244 : vector<16x32xf32>
    %c0_118 = arith.constant 0 : index
    %c0_119 = arith.constant 0 : index
    %246 = vector.load %arg12[%c0_118, %c0_119] : memref<1x32xf32, #tpu.memory_space<vmem>>, vector<1x32xf32>
    %247 = arith.mulf %245, %245 : vector<16x32xf32>
    %cst_120 = arith.constant dense<0.000000e+00> : vector<16xf32>
    %248 = vector.multi_reduction <add>, %247, %cst_120 [1] : vector<16x32xf32> to vector<16xf32>
    %249 = vector.shape_cast %248 : vector<16xf32> to vector<16x1xf32>
    %cst_121 = arith.constant 3.200000e+01 : f32
    %250 = vector.broadcast %cst_121 : f32 to vector<16x1xf32>
    %251 = arith.divf %249, %250 : vector<16x1xf32>
    %cst_122 = arith.constant 9.99999997E-7 : f32
    %252 = vector.broadcast %cst_122 : f32 to vector<16x1xf32>
    %253 = arith.addf %251, %252 : vector<16x1xf32>
    %254 = math.rsqrt %253 : vector<16x1xf32>
    %255 = vector.broadcast %254 : vector<16x1xf32> to vector<16x32xf32>
    %256 = arith.mulf %245, %255 : vector<16x32xf32>
    %257 = vector.broadcast %246 : vector<1x32xf32> to vector<16x32xf32>
    %258 = arith.mulf %256, %257 : vector<16x32xf32>
    %c0_123 = arith.constant 0 : index
    %c0_124 = arith.constant 0 : index
    %259 = vector.load %arg3[%c0_123, %c0_124] : memref<2x16xf32, #tpu.memory_space<vmem>>, vector<2x16xf32>
    %cst_125 = arith.constant dense<0.000000e+00> : vector<2x32xf32>
    %260 = tpu.matmul %259, %258, %cst_125 {dimension_numbers = #tpu.dot_dimension_numbers<[1], [0], [0], [1], [0, 0, 1, 1], [], []>} : vector<2x16xf32>, vector<16x32xf32>, vector<2x32xf32> -> vector<2x32xf32>
    %c0_126 = arith.constant 0 : index
    %c0_127 = arith.constant 0 : index
    %261 = vector.load %arg13[%c0_126, %c0_127] : memref<32x32xf32, #tpu.memory_space<vmem>>, vector<32x32xf32>
    %cst_128 = arith.constant dense<0.000000e+00> : vector<2x32xf32>
    %262 = tpu.matmul %260, %261, %cst_128 {dimension_numbers = #tpu.dot_dimension_numbers<[1], [0], [0], [1], [0, 0, 1, 1], [], []>} : vector<2x32xf32>, vector<32x32xf32>, vector<2x32xf32> -> vector<2x32xf32>
    %c0_129 = arith.constant 0 : index
    %c0_130 = arith.constant 0 : index
    %263 = vector.load %arg14[%c0_129, %c0_130] : memref<1x32xf32, #tpu.memory_space<vmem>>, vector<1x32xf32>
    %264 = vector.broadcast %263 : vector<1x32xf32> to vector<2x32xf32>
    %265 = arith.addf %262, %264 : vector<2x32xf32>
    %cst_131 = arith.constant dense<0.000000e+00> : vector<32xf32>
    %266 = vector.multi_reduction <add>, %265, %cst_131 [0] : vector<2x32xf32> to vector<32xf32>
    %267 = vector.shape_cast %266 : vector<32xf32> to vector<1x32xf32>
    %cst_132 = arith.constant 2.000000e+00 : f32
    %268 = vector.broadcast %cst_132 : f32 to vector<1x32xf32>
    %269 = arith.divf %267, %268 : vector<1x32xf32>
    %270 = vector.broadcast %269 : vector<1x32xf32> to vector<2x32xf32>
    %271 = arith.subf %265, %270 : vector<2x32xf32>
    %272 = arith.mulf %271, %271 : vector<2x32xf32>
    %cst_133 = arith.constant dense<0.000000e+00> : vector<32xf32>
    %273 = vector.multi_reduction <add>, %272, %cst_133 [0] : vector<2x32xf32> to vector<32xf32>
    %274 = vector.shape_cast %273 : vector<32xf32> to vector<1x32xf32>
    %cst_134 = arith.constant 2.000000e+00 : f32
    %275 = vector.broadcast %cst_134 : f32 to vector<1x32xf32>
    %276 = arith.divf %274, %275 : vector<1x32xf32>
    %277 = vector.broadcast %269 : vector<1x32xf32> to vector<2x32xf32>
    %278 = arith.subf %265, %277 : vector<2x32xf32>
    %cst_135 = arith.constant 9.99999974E-6 : f32
    %279 = vector.broadcast %cst_135 : f32 to vector<1x32xf32>
    %280 = arith.addf %276, %279 : vector<1x32xf32>
    %281 = math.rsqrt %280 : vector<1x32xf32>
    %282 = vector.broadcast %281 : vector<1x32xf32> to vector<2x32xf32>
    %283 = arith.mulf %278, %282 : vector<2x32xf32>
    %c0_136 = arith.constant 0 : index
    %c0_137 = arith.constant 0 : index
    %284 = vector.load %arg15[%c0_136, %c0_137] : memref<1x32xf32, #tpu.memory_space<vmem>>, vector<1x32xf32>
    %285 = vector.broadcast %284 : vector<1x32xf32> to vector<2x32xf32>
    %286 = arith.mulf %283, %285 : vector<2x32xf32>
    %c0_138 = arith.constant 0 : index
    %c0_139 = arith.constant 0 : index
    %287 = vector.load %arg16[%c0_138, %c0_139] : memref<1x32xf32, #tpu.memory_space<vmem>>, vector<1x32xf32>
    %288 = vector.broadcast %287 : vector<1x32xf32> to vector<2x32xf32>
    %289 = arith.addf %286, %288 : vector<2x32xf32>
    %c0_140 = arith.constant 0 : index
    %c0_141 = arith.constant 0 : index
    %290 = vector.load %arg17[%c0_140, %c0_141] : memref<32x256xf32, #tpu.memory_space<vmem>>, vector<32x256xf32>
    %cst_142 = arith.constant dense<0.000000e+00> : vector<2x256xf32>
    %291 = tpu.matmul %289, %290, %cst_142 {dimension_numbers = #tpu.dot_dimension_numbers<[1], [0], [0], [1], [0, 0, 1, 1], [], []>} : vector<2x32xf32>, vector<32x256xf32>, vector<2x256xf32> -> vector<2x256xf32>
    %c0_143 = arith.constant 0 : index
    %c0_144 = arith.constant 0 : index
    %292 = vector.load %arg1[%c0_143, %c0_144] : memref<2x5xf32, #tpu.memory_space<vmem>>, vector<2x5xf32>
    %c0_145 = arith.constant 0 : index
    %c0_146 = arith.constant 0 : index
    %293 = vector.load %arg18[%c0_145, %c0_146] : memref<5x256xf32, #tpu.memory_space<vmem>>, vector<5x256xf32>
    %cst_147 = arith.constant dense<0.000000e+00> : vector<2x256xf32>
    %294 = tpu.matmul %292, %293, %cst_147 {dimension_numbers = #tpu.dot_dimension_numbers<[1], [0], [0], [1], [0, 0, 1, 1], [], []>} : vector<2x5xf32>, vector<5x256xf32>, vector<2x256xf32> -> vector<2x256xf32>
    %295 = arith.addf %291, %294 : vector<2x256xf32>
    %c0_148 = arith.constant 0 : index
    %c0_149 = arith.constant 0 : index
    %296 = vector.load %arg19[%c0_148, %c0_149] : memref<1x256xf32, #tpu.memory_space<vmem>>, vector<1x256xf32>
    %297 = vector.broadcast %296 : vector<1x256xf32> to vector<2x256xf32>
    %298 = arith.addf %295, %297 : vector<2x256xf32>
    %cst_150 = arith.constant dense<0.000000e+00> : vector<256xf32>
    %299 = vector.multi_reduction <add>, %298, %cst_150 [0] : vector<2x256xf32> to vector<256xf32>
    %300 = vector.shape_cast %299 : vector<256xf32> to vector<1x256xf32>
    %cst_151 = arith.constant 2.000000e+00 : f32
    %301 = vector.broadcast %cst_151 : f32 to vector<1x256xf32>
    %302 = arith.divf %300, %301 : vector<1x256xf32>
    %303 = vector.broadcast %302 : vector<1x256xf32> to vector<2x256xf32>
    %304 = arith.subf %298, %303 : vector<2x256xf32>
    %305 = arith.mulf %304, %304 : vector<2x256xf32>
    %cst_152 = arith.constant dense<0.000000e+00> : vector<256xf32>
    %306 = vector.multi_reduction <add>, %305, %cst_152 [0] : vector<2x256xf32> to vector<256xf32>
    %307 = vector.shape_cast %306 : vector<256xf32> to vector<1x256xf32>
    %cst_153 = arith.constant 2.000000e+00 : f32
    %308 = vector.broadcast %cst_153 : f32 to vector<1x256xf32>
    %309 = arith.divf %307, %308 : vector<1x256xf32>
    %310 = vector.broadcast %302 : vector<1x256xf32> to vector<2x256xf32>
    %311 = arith.subf %298, %310 : vector<2x256xf32>
    %cst_154 = arith.constant 9.99999974E-6 : f32
    %312 = vector.broadcast %cst_154 : f32 to vector<1x256xf32>
    %313 = arith.addf %309, %312 : vector<1x256xf32>
    %314 = math.rsqrt %313 : vector<1x256xf32>
    %315 = vector.broadcast %314 : vector<1x256xf32> to vector<2x256xf32>
    %316 = arith.mulf %311, %315 : vector<2x256xf32>
    %c0_155 = arith.constant 0 : index
    %c0_156 = arith.constant 0 : index
    %317 = vector.load %arg20[%c0_155, %c0_156] : memref<1x256xf32, #tpu.memory_space<vmem>>, vector<1x256xf32>
    %318 = vector.broadcast %317 : vector<1x256xf32> to vector<2x256xf32>
    %319 = arith.mulf %316, %318 : vector<2x256xf32>
    %c0_157 = arith.constant 0 : index
    %c0_158 = arith.constant 0 : index
    %320 = vector.load %arg21[%c0_157, %c0_158] : memref<1x256xf32, #tpu.memory_space<vmem>>, vector<1x256xf32>
    %321 = vector.broadcast %320 : vector<1x256xf32> to vector<2x256xf32>
    %322 = arith.addf %319, %321 : vector<2x256xf32>
    %cst_159 = arith.constant 0.000000e+00 : f32
    %323 = vector.broadcast %cst_159 : f32 to vector<2x256xf32>
    %324 = arith.cmpf oge, %322, %323 : vector<2x256xf32>
    %cst_160 = arith.constant 2.000000e-01 : f32
    %325 = vector.broadcast %cst_160 : f32 to vector<2x256xf32>
    %326 = arith.mulf %325, %322 : vector<2x256xf32>
    %327 = arith.select %324, %322, %326 : vector<2x256xi1>, vector<2x256xf32>
    %c0_161 = arith.constant 0 : index
    %c0_162 = arith.constant 0 : index
    %328 = vector.load %arg22[%c0_161, %c0_162] : memref<1x256xf32, #tpu.memory_space<vmem>>, vector<1x256xf32>
    %329 = vector.broadcast %328 : vector<1x256xf32> to vector<2x256xf32>
    %330 = arith.mulf %327, %329 : vector<2x256xf32>
    %cst_163 = arith.constant dense<0.000000e+00> : vector<2xf32>
    %331 = vector.multi_reduction <add>, %330, %cst_163 [1] : vector<2x256xf32> to vector<2xf32>
    %332 = vector.shape_cast %331 : vector<2xf32> to vector<2x1xf32>
    %c0_164 = arith.constant 0 : index
    %c0_165 = arith.constant 0 : index
    %333 = vector.load %arg23[%c0_164, %c0_165] : memref<1x1xf32, #tpu.memory_space<vmem>>, vector<1x1xf32>
    %334 = vector.broadcast %333 : vector<1x1xf32> to vector<2x1xf32>
    %335 = arith.addf %332, %334 : vector<2x1xf32>
    %c0_166 = arith.constant 0 : index
    %c0_167 = arith.constant 0 : index
    %336 = vector.load %arg24[%c0_166, %c0_167] : memref<2x1xf32, #tpu.memory_space<vmem>>, vector<2x1xf32>
    tpu.vector_store %arg24[%c0_166, %c0_167], %335 {strides = array<i32>} : memref<2x1xf32, #tpu.memory_space<vmem>>, vector<2x1xf32>,
    return
  }
}

</mosaic_0001>

<bundles_post_ra>
// kernel: discriminator_forward.1
= control target key start
LH: loop header
LB: loop body
LE: loop exit
PB: predicated region body
PF: predicated region fallthrough
CT: control target
= control target key end

     0   :  { %v4000_v0 = vmov 0   ;;  %v81_v15 = vlaneseq  ;;  %vm101_vm0 = vcmask 523264   ;;  %v4001_v18 = vmov 0.0   ;;  %s4811_s0 = inlined_call_operand.vmem [shape: s32[16,1], index: 0, kind: input, shape index: {}]   ;;  %s4812_s5 = inlined_call_operand.vmem [shape: f32[64,32], index: 5, kind: input, shape index: {}]   ;;  %s4813_s7 = inlined_call_operand.vmem [shape: f32[2,32,96], index: 7, kind: input, shape index: {}]   ;;  %s4814_s6 = inlined_call_operand.vmem [shape: f32[2,1,32], index: 6, kind: input, shape index: {}]   ;;  %s4815_s4 = inlined_call_operand.vmem [shape: f32[4,16,32], index: 4, kind: input, shape index: {}]   ;;  %s4816_s2 = inlined_call_operand.vmem [shape: f32[16,16], index: 2, kind: input, shape index: {}]   ;;  %s4817_s8 = inlined_call_operand.vmem [shape: f32[2,32,32], index: 8, kind: input, shape index: {}]   ;;  %s4818_s10 = inlined_call_operand.vmem [shape: f32[2,32,64], index: 10, kind: input, shape index: {}]   ;;  %s4819_s11 = inlined_call_operand.vmem [shape: f32[2,64,32], index: 11, kind: input, shape index: {}]   ;;  %s4820_s9 = inlined_call_operand.vmem [shape: f32[2,1,32], index: 9, kind: input, shape index: {}]   ;;  %s4821_s12 = inlined_call_operand.vmem [shape: f32[1,32], index: 12, kind: input, shape index: {}]   ;;  %s4822_s13 = inlined_call_operand.vmem [shape: f32[32,32], index: 13, kind: input, shape index: {}]   ;;  %s4823_s3 = inlined_call_operand.vmem [shape: f32[2,16], index: 3, kind: input, shape index: {}]   ;;  %s4824_s18 = inlined_call_operand.vmem [shape: f32[5,256], index: 18, kind: input, shape index: {}]   ;;  %s4825_s17 = inlined_call_operand.vmem [shape: f32[32,256], index: 17, kind: input, shape index: {}]   ;;  %s4826_s1 = inlined_call_operand.vmem [shape: f32[2,5], index: 1, kind: input, shape index: {}]   ;;  %s4827_s14 = inlined_call_operand.vmem [shape: f32[1,32], index: 14, kind: input, shape index: {}]   ;;  %s4828_s15 = inlined_call_operand.vmem [shape: f32[1,32], index: 15, kind: input, shape index: {}]   ;;  %s4829_s16 = inlined_call_operand.vmem [shape: f32[1,32], index: 16, kind: input, shape index: {}]   ;;  %s4830_s23 = inlined_call_operand.<no memory space> [shape: f32[1,1], index: 23, kind: input, shape index: {}]   ;;  %s4831_s19 = inlined_call_operand.vmem [shape: f32[1,256], index: 19, kind: input, shape index: {}]   ;;  %s4832_s20 = inlined_call_operand.vmem [shape: f32[1,256], index: 20, kind: input, shape index: {}]   ;;  %s4833_s21 = inlined_call_operand.vmem [shape: f32[1,256], index: 21, kind: input, shape index: {}]   ;;  %s4834_s22 = inlined_call_operand.vmem [shape: f32[1,256], index: 22, kind: input, shape index: {}]   ;;  %s4835_s24 = inlined_call_operand.vmem [shape: f32[2,1], index: 24, kind: output, shape index: {}]  }
   0x1   :  { %4848 = sst [smem:[#allocation3_spill]] %s4811_s0  ;;  %3859 = vset.pattern.permute.xlu0 %v4000_v0  ;;  %vm188_vm3 = vcmask 261120   ;;  %vm392_vm5 = vcmask 130048   ;;  %vm4005_vm6 = vmmov 0   ;;  %vm2870_vm7 = vcmask 1044480  }
   0x2   :  { %4849 = sst [smem:[#allocation4_spill]] %s4812_s5  ;;  %s4857_s27 = sld [smem:[#allocation3_spill]]  ;;  %v82_v16 = vand.u32 127, %v81_v15  ;;  %vm4220_vm4 = vmpackc.low %vm188_vm3, %vm188_vm3  ;;  %vm2866_vm8 = vcmask 39936   ;;  %vm2816_vm9 = vcmask 254976   ;;  %vm3036_vm10 = vcmask 1041408  }
   0x3   :  { %4850 = sst [smem:[#allocation5_spill]] %s4813_s7  ;;  %s4858_s7 = sld [smem:[#allocation4_spill]]  ;;  %vm3140_vm13 = vcmask 1024  }
   0x4   :  { %4851 = sst [smem:[#allocation6_spill]] %s4814_s6  ;;  %s4859_s30 = sld [smem:[#allocation5_spill]] }
   0x5   :  { %4852 = sst [smem:[#allocation7_spill]] %s4815_s4  ;;  %s4847_s6 = smov 96  }
   0x6   :  { %4853 = sst [smem:[#allocation8_spill]] %s4816_s2  ;;  %s4861_s0 = sld [smem:[#allocation7_spill]] }
   0x7   :  { %4854 = sst [smem:[#allocation9_spill]] %s4817_s8  ;;  %s4860_s8 = sld [smem:[#allocation6_spill]] }
   0x8   :  { %4855 = sst [smem:[#allocation10_spill]] %s4818_s10  ;;  %v79_v1 = vld [vmem:[%s4857_s27] sm:$0xff]  ;;  %v80_v6 = vld [vmem:[%s4857_s27 + $0x8] sm:$0xff]  ;;  %s4864_s28 = sld [smem:[#allocation8_spill]] }
   0x9   :  { %4856 = sst [smem:[#allocation11_spill]] %s4819_s11  ;;  %v93_v2 = vld [vmem:[%s4858_s7] sm:$0xff]  ;;  %84 = vperm.xlu0 %3859, %v79_v1   ;;  %v94_v3 = vld [vmem:[%s4858_s7 + $0x8] sm:$0xff]  ;;  %v95_v4 = vld [vmem:[%s4858_s7 + $0x10] sm:$0xff]  ;;  %s4865_s27 = sld [smem:[#allocation9_spill]] }
   0xa   :  { %v96_v5 = vld [vmem:[%s4858_s7 + $0x18] sm:$0xff]  ;;  %v3646_v7 = vpack.c.bf16 %v94_v3, %v93_v2  ;;  %v97_v9 = vld [vmem:[%s4858_s7 + $0x20] sm:$0xff]  ;;  %v98_v10 = vld [vmem:[%s4858_s7 + $0x28] sm:$0xff] }
   0xb   :  { %v3650_v8 = vpack.c.bf16 %v96_v5, %v95_v4  ;;  %v3654_v11 = vpack.c.bf16 %v98_v10, %v97_v9  ;;  %v99_v12 = vld [vmem:[%s4858_s7 + $0x30] sm:$0xff]  ;;  %v100_v13 = vld [vmem:[%s4858_s7 + $0x38] sm:$0xff]  ;;  %v212_v28 = vld [vmem:[%s4859_s30] sm:$0xff]  ;;  %s4845_s7 = smov 64  }
   0xc   :  { %3647 = vmatprep.subr.bf16.mxu0 %v3646_v7  ;;  %v3658_v14 = vpack.c.bf16 %v100_v13, %v99_v12  ;;  %v213_v29 = vld [vmem:[%s4859_s30 + $0x8] sm:$0xff]  ;;  %v214_v30 = vld [vmem:[%s4859_s30 + $0x10] sm:$0xff]  ;;  %v215_v32 = vld [vmem:[%s4859_s30 + $0x18] sm:$0xff] }
   0xd   :  { %87 = vperm.xlu0 %3859, %v80_v6   ;;  %3649 = vmatpush3.bf16.msra.mxu0 %v3646_v7  ;;  %v3662_v31 = vpack.c.bf16 %v213_v29, %v212_v28  ;;  %v3666_v33 = vpack.c.bf16 %v215_v32, %v214_v30  ;;  %v3148_v41 = vld [vmem:[%s4860_s8] ss:$0 sm:$0xff]  ;;  %v4203_v48 = vld [vmem:[%s4861_s0 + $0x10] sm:$0xff]  ;;  %v4241_v59 = vld [vmem:[%s4861_s0 + $0x8] sm:$0xff] }
   0xe   :  { %3651 = vmatprep.subr.bf16.mxu0 %v3650_v8  ;;  %v4198_v47 = vld [vmem:[%s4861_s0] sm:$0xff]  ;;  %v4246_v60 = vld [vmem:[%s4861_s0 + $0x18] sm:$0xff]  ;;  %v4257_v63 = vld [vmem:[%s4864_s28 + $0x8] sm:$0xff] }
   0xf   :  { %3663 = vmatprep.subr.bf16.mxu1 %v3662_v31  ;;  %v4262_v0 = vld [vmem:[%s4864_s28] sm:$0xff]  ;;  %s4867_s28 = sld [smem:[#allocation11_spill]] }
  0x10   :  { %3665 = vmatpush3.bf16.msra.mxu1 %v3662_v31  ;;  %v4292_v32 = vld [vmem:[%s4861_s0 + $0x20] sm:$0xff] }
  0x11   :  { %3653 = vmatpush3.bf16.msra.mxu0 %v3650_v8  ;;  %3667 = vmatprep.subr.bf16.mxu1 %v3666_v33 }
  0x12   :  { %3655 = vmatprep.subr.bf16.mxu0 %v3654_v11 }
  0x14   :  { %3669 = vmatpush3.bf16.msra.mxu1 %v3666_v33 }
  0x15   :  { %3657 = vmatpush3.bf16.msra.mxu0 %v3654_v11 }
  0x16   :  { %3659 = vmatprep.subr.bf16.mxu0 %v3658_v14 }
  0x19   :  { %3661 = vmatpush3.bf16.msra.mxu0 %v3658_v14 }
  0x88   :  { %v85_v17 = vpop.permute.xlu0 %84 }
  0x89   :  { %vm89_vm1 = vcmp.eq.s32.totalorder %v82_v16, %v85_v17 }
  0x8a   :  { %v91_v19 = vsel %vm89_vm1, 1.0, %v4001_v18 }
  0x8b   :  { %3409 = vmatprep.mubr.msk.f32.mxu0 %vm101_vm0, %v91_v19 }
  0x8c   :  { %v88_v20 = vpop.permute.xlu0 %87 }
  0x8d   :  { %vm90_vm2 = vcmp.eq.s32.totalorder %v82_v16, %v88_v20 }
  0x8e   :  { %v92_v21 = vsel %vm90_vm2, 1.0, %v4001_v18 }
  0x8f   :  { %3410 = vmatmul.mubr.msk.f32.vlgmr.msra.gmra.mrb[0].mxu0 %vm101_vm0, %v92_v21 }
 0x162   :  { %v4166_v22 = vpop.f32.mrb[0].mxu0 }
 0x163   :  { %v4168_v23 = vpop.f32.mrb[1].mxu0  ;;  %v187_v26 = vmul.f32 %v4166_v22, %v4166_v22 }
 0x164   :  { %v186_v24 = vmul.f32 %v4168_v23, %v4168_v23 }
 0x165   :  { %v192_v27 = vsel %vm188_vm3, %v187_v26, 0.0 }
 0x166   :  { %v189_v25 = vsel %vm188_vm3, %v186_v24, 0.0 }
 0x167   :  { %190 = vadd.xlane.f32.xlu1 %v189_v25 }
 0x16b   :  { %193 = vadd.xlane.f32.xlu1 %v192_v27 }
 0x1f4   :  { %v191_v34 = vpop.xlane.xlu1 %190 }
 0x1f5   :  { %v196_v35 = vmul.f32 0.03125, %v191_v34 }
 0x1f7   :  { %v198_v36 = vadd.f32 1e-06, %v196_v35 }
 0x1f8   :  { %v194_v37 = vpop.xlane.xlu1 %193 }
 0x1f9   :  { %3910 = vrsqrt.f32 %v198_v36  ;;  %v197_v38 = vmul.f32 0.03125, %v194_v37 }
 0x1fb   :  { %v199_v39 = vadd.f32 1e-06, %v197_v38 }
 0x1fd   :  { %3912 = vrsqrt.f32 %v199_v39 }
 0x203   :  { %v3911_v40 = vpop.eup %3910 }
 0x204   :  { %v202_v42 = vmul.f32 %v3911_v40, %v4168_v23 }
 0x206   :  { %v210_v43 = vmul.f32 %v3148_v41, %v202_v42 }
 0x207   :  { %v3913_v44 = vpop.eup %3912 }
 0x208   :  { %v203_v45 = vmul.f32 %v3913_v44, %v4166_v22  ;;  %3420 = vmatprep.mubr.msk.f32.mxu1 %vm188_vm3, %v210_v43 }
 0x20a   :  { %v211_v46 = vmul.f32 %v3148_v41, %v203_v45 }
 0x20c   :  { %3421 = vmatmul.mubr.msk.f32.vlgmr.msra.gmra.mrb[0].mxu1 %vm188_vm3, %v211_v46 }
 0x2df   :  { %v4205_v49 = vpop.f32.mrb[0].mxu1 }
 0x2e0   :  { %v4207_v50 = vpop.f32.mrb[1].mxu1  ;;  %v300_v61 = vmul.f32 %v4205_v49, %v4241_v59  ;;  %v429_v62 = vmul.f32 %v4205_v49, %v4246_v60 }
 0x2e1   :  { %v3860_v51 = vpack.i.bf16 %v4205_v49, %v4207_v50  ;;  %v299_v52 = vmul.f32 %v4198_v47, %v4207_v50  ;;  %v428_v53 = vmul.f32 %v4203_v48, %v4207_v50  ;;  %v724_v46 = vmul.f32 %v4292_v32, %v4207_v50 }
 0x2e3   :  { %3861 = vrot.lane.b32.xlu0 %v3860_v51, %s4847_s6  ;;  %3427 = vmatprep.mubr.msk.f32.mxu1 %vm188_vm3, %v299_v52 }
 0x2e4   :  { %3434 = vmatprep.mubr.msk.f32.mxu0 %vm188_vm3, %v428_v53  ;;  %v4314_v53 = vld [vmem:[%s4861_s0 + $0x28] sm:$0xff] }
 0x355   :  { %v3862_v54 = vpop.permute.xlu0 %3861 }
 0x356   :  { %v3864_v55 = vunpack.i.h.bf16 %v3862_v54  ;;  %v3863_v56 = vunpack.i.l.bf16 %v3862_v54  ;;  %v725_v54 = vmul.f32 %v4205_v49, %v4314_v53 }
 0x358   :  { %v4224_v58 = vpack.c.bf16 %v3864_v55, %v3863_v56 }
 0x35a   :  { %3672 = vmatprep.subr.msk.bf16.mxu1 %vm4220_vm4, %v4224_v58  ;;  %3678 = vmatprep.subr.msk.bf16.mxu0 %vm4220_vm4, %v4224_v58 }
 0x35b   :  { %3675 = vmatpush3.bf16.xpose.msk.msra.mxu1 %vm4220_vm4, %v4224_v58  ;;  %3681 = vmatpush3.bf16.xpose.msk.msra.mxu0 %vm4220_vm4, %v4224_v58 }
 0x362   :  { %3428 = vmatmul.mubr.msk.f32.vlgmr.msra.gmra.mrb[2].mxu1 %vm188_vm3, %v300_v61  ;;  %3435 = vmatmul.mubr.msk.f32.vlgmr.msra.gmra.mrb[2].mxu0 %vm188_vm3, %v429_v62 }
 0x435   :  { %v3429_v1 = vpop.f32.mrb[2].mxu1  ;;  %v3436_v2 = vpop.f32.mrb[2].mxu0 }
 0x436   :  { %v508_v3 = vadd.f32 %v3436_v2, %v4257_v63  ;;  %v383_v4 = vpop.f32.mrb[3].mxu1  ;;  %v502_v5 = vpop.f32.mrb[3].mxu0  ;;  %v389_v27 = vadd.f32 %v3429_v1, %v4257_v63 }
 0x437   :  { %v503_v6 = vadd.f32 %v502_v5, %v4262_v0  ;;  %v384_v30 = vadd.f32 %v383_v4, %v4262_v0 }
 0x438   :  { %v514_v7 = vsel %vm392_vm5, %v508_v3, -inf  ;;  %v396_v29 = vsel %vm392_vm5, %v389_v27, -inf }
 0x439   :  { %515 = vmax.xlane.f32.xlu0 %v514_v7  ;;  %v511_v8 = vsel %vm392_vm5, %v503_v6, -inf  ;;  %v393_v31 = vsel %vm392_vm5, %v384_v30, -inf }
 0x43a   :  { %512 = vmax.xlane.f32.xlu1 %v511_v8 }
 0x44b   :  { %535 = vrot.lane.b32.xlu1 %v4203_v48, %s4845_s7 }
 0x44f   :  { %537 = vrot.lane.b32.xlu1 %v4246_v60, %s4845_s7 }
 0x4c6   :  { %v516_v9 = vpop.xlane.xlu0 %515 }
 0x4c7   :  { %v518_v10 = vsub.f32 %v508_v3, %v516_v9  ;;  %v513_v11 = vpop.xlane.xlu1 %512 }
 0x4c8   :  { %v517_v12 = vsub.f32 %v503_v6, %v513_v11 }
 0x4c9   :  { %v521_v13 = vmul.f32 1.442695, %v518_v10 }
 0x4ca   :  { %v519_v14 = vmul.f32 1.442695, %v517_v12 }
 0x4cb   :  { %3914 = vpow2.f32 %v521_v13  ;;  %v4272_v16 = vpop.permute.xlu1 %535 }
 0x4cc   :  { %3916 = vpow2.f32 %v519_v14  ;;  %v541_v19 = vmul.f32 %v4272_v16, %v4207_v50 }
 0x4cf   :  { %v4274_v17 = vpop.permute.xlu1 %537 }
 0x4d0   :  { %v542_v20 = vmul.f32 %v4205_v49, %v4274_v17 }
 0x4d2   :  { %v3865_v21 = vpack.i.bf16 %v542_v20, %v541_v19 }
 0x4d5   :  { %v3915_v24 = vpop.eup %3914 }
 0x4d6   :  { %v3917_v25 = vpop.eup %3916  ;;  %v526_v26 = vsel %vm392_vm5, %v3915_v24, 0.0 }
 0x4d7   :  { %527 = vadd.xlane.f32.xlu0 %v526_v26  ;;  %v523_v28 = vsel %vm392_vm5, %v3917_v25, 0.0 }
 0x4d8   :  { %524 = vadd.xlane.f32.xlu1 %v523_v28 }
 0x4dc   :  { %397 = vmax.xlane.f32.xlu1 %v396_v29 }
 0x4ed   :  { %3866 = vrot.lane.b32.xlu0 %v3865_v21, %s4845_s7  ;;  %417 = vrot.lane.b32.xlu1 %v4198_v47, %s4845_s7 }
 0x50c   :  { %394 = vmax.xlane.f32.xlu0 %v393_v31 }
 0x522   :  { %831 = vrot.lane.b32.xlu0 %v4292_v32, %s4845_s7 }
 0x564   :  { %v528_v33 = vpop.xlane.xlu0 %527 }
 0x565   :  { %3918 = vrcp.f32 %v528_v33  ;;  %v525_v34 = vpop.xlane.xlu1 %524 }
 0x566   :  { %3920 = vrcp.f32 %v525_v34 }
 0x568   :  { %v3867_v35 = vpop.permute.xlu0 %3866 }
 0x569   :  { %v3869_v36 = vunpack.i.h.bf16 %v3867_v35  ;;  %v3868_v37 = vunpack.i.l.bf16 %v3867_v35  ;;  %v398_v38 = vpop.xlane.xlu1 %397 }
 0x56a   :  { %v400_v39 = vsub.f32 %v389_v27, %v398_v38 }
 0x56b   :  { %v3682_v40 = vpack.c.bf16 %v3869_v36, %v3868_v37 }
 0x56c   :  { %v403_v41 = vmul.f32 1.442695, %v400_v39 }
 0x56d   :  { %3683 = vmatprep.subr.bf16.mxu0 %v3682_v40  ;;  %v4332_v10 = vpop.permute.xlu1 %417 }
 0x56e   :  { %3922 = vpow2.f32 %v403_v41  ;;  %3685 = vmatpush3.bf16.msra.mxu0 %v3682_v40 }
 0x56f   :  { %v3919_v42 = vpop.eup %3918  ;;  %3692 = vmatprep.subr.msk.bf16.mxu0 %vm4220_vm4, %v4224_v58 }
 0x570   :  { %v3921_v43 = vpop.eup %3920  ;;  %v532_v45 = vmul.f32 %v3919_v42, %v3915_v24  ;;  %v423_v24 = vmul.f32 %v4332_v10, %v4207_v50 }
 0x571   :  { %v531_v44 = vmul.f32 %v3921_v43, %v3917_v25 }
 0x573   :  { %3441 = vmatprep.mubr.msk.f32.mxu0 %vm392_vm5, %v531_v44 }
 0x574   :  { %3442 = vmatmul.mubr.msk.f32.vlgmr.msra.gmra.mrb[4].mxu0 %vm392_vm5, %v532_v45 }
 0x575   :  { %3455 = vmatprep.mubr.msk.f32.mxu0 %vm188_vm3, %v724_v46 }
 0x577   :  { %3695 = vmatpush3.bf16.xpose.msk.msra.mxu0 %vm4220_vm4, %v4224_v58 }
 0x578   :  { %v4307_v51 = vpop.eup %3922 }
 0x579   :  { %v408_v52 = vsel %vm392_vm5, %v4307_v51, 0.0 }
 0x57a   :  { %409 = vadd.xlane.f32.xlu0 %v408_v52 }
 0x57e   :  { %3456 = vmatmul.mubr.msk.f32.vlgmr.msra.gmra.mrb[6].mxu0 %vm188_vm3, %v725_v54 }
 0x599   :  { %v395_v5 = vpop.xlane.xlu0 %394 }
 0x59a   :  { %v399_v6 = vsub.f32 %v384_v30, %v395_v5 }
 0x59c   :  { %v401_v7 = vmul.f32 1.442695, %v399_v6  ;;  %v4362_v6 = vld [vmem:[%s4861_s0 + $0x30] sm:$0xff] }
 0x59d   :  { %v4340_v26 = vpop.permute.xlu0 %831 }
 0x59e   :  { %3924 = vpow2.f32 %v401_v7  ;;  %v837_v29 = vmul.f32 %v4340_v26, %v4207_v50 }
 0x5a8   :  { %v3925_v8 = vpop.eup %3924 }
 0x5a9   :  { %v405_v9 = vsel %vm392_vm5, %v3925_v8, 0.0 }
 0x607   :  { %v410_v40 = vpop.xlane.xlu0 %409 }
 0x647   :  { %v4319_v55 = vpop.f32.mrb[4].mxu0 }
 0x648   :  { %v4321_v56 = vpop.f32.mrb[5].mxu0 }
 0x651   :  { %v3457_v61 = vpop.f32.mrb[6].mxu0 }
 0x652   :  { %v804_v62 = vadd.f32 %v3457_v61, %v4257_v63  ;;  %v798_v1 = vpop.f32.mrb[7].mxu0 }
 0x653   :  { %v799_v2 = vadd.f32 %v798_v1, %v4262_v0 }
 0x654   :  { %v810_v3 = vsel %vm392_vm5, %v804_v62, -inf }
 0x655   :  { %811 = vmax.xlane.f32.xlu1 %v810_v3  ;;  %v807_v4 = vsel %vm392_vm5, %v799_v2, -inf }
 0x659   :  { %808 = vmax.xlane.f32.xlu1 %v807_v4 }
 0x66a   :  { %419 = vrot.lane.b32.xlu1 %v4241_v59, %s4845_s7 }
 0x66e   :  { %833 = vrot.lane.b32.xlu1 %v4314_v53, %s4845_s7 }
 0x692   :  { %406 = vadd.xlane.f32.xlu1 %v405_v9 }
 0x6e2   :  { %v812_v11 = vpop.xlane.xlu1 %811 }
 0x6e3   :  { %v814_v12 = vsub.f32 %v804_v62, %v812_v11 }
 0x6e5   :  { %v817_v13 = vmul.f32 1.442695, %v814_v12 }
 0x6e6   :  { %v809_v14 = vpop.xlane.xlu1 %808 }
 0x6e7   :  { %3926 = vpow2.f32 %v817_v13  ;;  %v813_v19 = vsub.f32 %v799_v2, %v809_v14 }
 0x6e9   :  { %v815_v20 = vmul.f32 1.442695, %v813_v19 }
 0x6ea   :  { %v4334_v21 = vpop.permute.xlu1 %419 }
 0x6eb   :  { %3928 = vpow2.f32 %v815_v20  ;;  %v424_v25 = vmul.f32 %v4205_v49, %v4334_v21 }
 0x6ed   :  { %v3870_v27 = vpack.i.bf16 %v424_v25, %v423_v24 }
 0x6ee   :  { %v4342_v28 = vpop.permute.xlu1 %833 }
 0x6ef   :  { %v838_v30 = vmul.f32 %v4205_v49, %v4342_v28 }
 0x6f1   :  { %v3927_v31 = vpop.eup %3926  ;;  %v3875_v33 = vpack.i.bf16 %v838_v30, %v837_v29 }
 0x6f2   :  { %v822_v34 = vsel %vm392_vm5, %v3927_v31, 0.0 }
 0x6f3   :  { %823 = vadd.xlane.f32.xlu1 %v822_v34  ;;  %3876 = vrot.lane.b32.xlu0 %v3875_v33, %s4845_s7 }
 0x6f5   :  { %v3929_v35 = vpop.eup %3928 }
 0x6f6   :  { %v819_v36 = vsel %vm392_vm5, %v3929_v35, 0.0 }
 0x6f7   :  { %820 = vadd.xlane.f32.xlu1 %v819_v36 }
 0x708   :  { %3871 = vrot.lane.b32.xlu1 %v3870_v27, %s4845_s7 }
 0x71f   :  { %v407_v37 = vpop.xlane.xlu1 %406 }
 0x720   :  { %3930 = vrcp.f32 %v407_v37 }
 0x721   :  { %3932 = vrcp.f32 %v410_v40 }
 0x72a   :  { %v3931_v38 = vpop.eup %3930 }
 0x72b   :  { %v413_v39 = vmul.f32 %v3931_v38, %v3925_v8  ;;  %v3933_v62 = vpop.eup %3932  ;;  %v4374_v8 = vld [vmem:[%s4861_s0 + $0x38] sm:$0xff]  ;;  %s4866_s0 = sld [smem:[#allocation10_spill]] }
 0x72c   :  { %v414_v3 = vmul.f32 %v3933_v62, %v4307_v51  ;;  %v933_v51 = vmul.f32 %v4362_v6, %v4207_v50  ;;  %v934_v9 = vmul.f32 %v4205_v49, %v4374_v8 }
 0x72d   :  { %3448 = vmatprep.mubr.msk.f32.mxu1 %vm392_vm5, %v413_v39 }
 0x765   :  { %v3877_v43 = vpop.permute.xlu0 %3876 }
 0x766   :  { %v3879_v45 = vunpack.i.h.bf16 %v3877_v43  ;;  %v3878_v46 = vunpack.i.l.bf16 %v3877_v43 }
 0x768   :  { %v3696_v1 = vpack.c.bf16 %v3879_v45, %v3878_v46 }
 0x780   :  { %v824_v41 = vpop.xlane.xlu1 %823 }
 0x784   :  { %v821_v42 = vpop.xlane.xlu1 %820 }
 0x785   :  { %3934 = vrcp.f32 %v821_v42 }
 0x786   :  { %3936 = vrcp.f32 %v824_v41  ;;  %v1140_v41 = vld [vmem:[%s4865_s27 + $0x8] sm:$0xff] }
 0x788   :  { %v3872_v44 = vpop.permute.xlu1 %3871 }
 0x789   :  { %v3874_v52 = vunpack.i.h.bf16 %v3872_v44  ;;  %v3873_v54 = vunpack.i.l.bf16 %v3872_v44 }
 0x78b   :  { %v3686_v61 = vpack.c.bf16 %v3874_v52, %v3873_v54 }
 0x78d   :  { %3687 = vmatprep.subr.bf16.mxu1 %v3686_v61 }
 0x78e   :  { %3689 = vmatpush3.bf16.msra.mxu1 %v3686_v61 }
 0x78f   :  { %v3935_v2 = vpop.eup %3934  ;;  %3697 = vmatprep.subr.bf16.mxu1 %v3696_v1 }
 0x790   :  { %v827_v4 = vmul.f32 %v3935_v2, %v3929_v35  ;;  %v3937_v5 = vpop.eup %3936  ;;  %v1141_v2 = vld [vmem:[%s4865_s27 + $0x10] sm:$0xff] }
 0x791   :  { %3449 = vmatmul.mubr.msk.f32.vlgmr.msra.gmra.mrb[4].mxu1 %vm392_vm5, %v414_v3  ;;  %v828_v7 = vmul.f32 %v3937_v5, %v3927_v31  ;;  %v1142_v3 = vld [vmem:[%s4865_s27 + $0x18] sm:$0xff] }
 0x792   :  { %3699 = vmatpush3.bf16.msra.mxu1 %v3696_v1  ;;  %3462 = vmatprep.mubr.msk.f32.mxu1 %vm392_vm5, %v827_v4  ;;  %v3714_v4 = vpack.c.bf16 %v1142_v3, %v1141_v2  ;;  %v1344_v2 = vld [vmem:[%s4867_s28 + $0x30] sm:$0xff]  ;;  %v1345_v3 = vld [vmem:[%s4867_s28 + $0x38] sm:$0xff] }
 0x793   :  { %3702 = vmatprep.subr.msk.bf16.mxu1 %vm4220_vm4, %v4224_v58 }
 0x799   :  { %3463 = vmatmul.mubr.msk.f32.vlgmr.msra.gmra.mrb[4].mxu1 %vm392_vm5, %v828_v7 }
 0x79a   :  { %3469 = vmatprep.mubr.msk.f32.mxu1 %vm188_vm3, %v933_v51 }
 0x79b   :  { %3705 = vmatpush3.bf16.xpose.msk.msra.mxu1 %vm4220_vm4, %v4224_v58 }
 0x7a2   :  { %3470 = vmatmul.mubr.msk.f32.vlgmr.msra.gmra.mrb[6].mxu1 %vm188_vm3, %v934_v9 }
 0x875   :  { %v3471_v11 = vpop.f32.mrb[6].mxu1 }
 0x876   :  { %v1013_v12 = vadd.f32 %v3471_v11, %v4257_v63  ;;  %v1007_v13 = vpop.f32.mrb[7].mxu1 }
 0x877   :  { %v1008_v14 = vadd.f32 %v1007_v13, %v4262_v0 }
 0x878   :  { %v1019_v19 = vsel %vm392_vm5, %v1013_v12, -inf }
 0x879   :  { %1020 = vmax.xlane.f32.xlu0 %v1019_v19  ;;  %v1016_v58 = vsel %vm392_vm5, %v1008_v14, -inf }
 0x87a   :  { %1017 = vmax.xlane.f32.xlu1 %v1016_v58 }
 0x88b   :  { %1040 = vrot.lane.b32.xlu1 %v4362_v6, %s4845_s7 }
 0x88f   :  { %1042 = vrot.lane.b32.xlu0 %v4374_v8, %s4845_s7 }
 0x906   :  { %v1021_v20 = vpop.xlane.xlu0 %1020 }
 0x907   :  { %v1023_v24 = vsub.f32 %v1013_v12, %v1021_v20  ;;  %v1018_v25 = vpop.xlane.xlu1 %1017  ;;  %v1253_v20 = vld [vmem:[%s4866_s0 + $0x10] sm:$0xff] }
 0x908   :  { %v1022_v27 = vsub.f32 %v1008_v14, %v1018_v25  ;;  %v1254_v25 = vld [vmem:[%s4866_s0 + $0x18] sm:$0xff] }
 0x909   :  { %v1026_v29 = vmul.f32 1.442695, %v1023_v24 }
 0x90a   :  { %v1024_v30 = vmul.f32 1.442695, %v1022_v27  ;;  %v4387_v31 = vpop.permute.xlu0 %1042  ;;  %v3722_v27 = vpack.c.bf16 %v1254_v25, %v1253_v20  ;;  %v3193_v25 = vld [vmem:[%s4859_s30 + $0x38] sm:$0xff] }
 0x90b   :  { %3938 = vpow2.f32 %v1026_v29  ;;  %v1047_v33 = vmul.f32 %v4205_v49, %v4387_v31  ;;  %v4391_v34 = vpop.permute.xlu1 %1040  ;;  %v1139_v49 = vld [vmem:[%s4865_s27] sm:$0xff] }
 0x90c   :  { %3940 = vpow2.f32 %v1024_v30  ;;  %v1046_v35 = vmul.f32 %v4391_v34, %v4207_v50  ;;  %v3710_v50 = vpack.c.bf16 %v1140_v41, %v1139_v49  ;;  %v1338_v29 = vld [vmem:[%s4867_s28] sm:$0xff]  ;;  %v1339_v30 = vld [vmem:[%s4867_s28 + $0x8] sm:$0xff] }
 0x90e   :  { %v3880_v36 = vpack.i.bf16 %v1047_v33, %v1046_v35  ;;  %3711 = vmatprep.subr.bf16.mxu0 %v3710_v50  ;;  %v1340_v33 = vld [vmem:[%s4867_s28 + $0x10] sm:$0xff]  ;;  %v3726_v35 = vpack.c.bf16 %v1339_v30, %v1338_v29 }
 0x90f   :  { %3713 = vmatpush3.bf16.msra.mxu0 %v3710_v50 }
 0x910   :  { %3715 = vmatprep.subr.bf16.mxu0 %v3714_v4 }
 0x913   :  { %3717 = vmatpush3.bf16.msra.mxu0 %v3714_v4  ;;  %v3738_v4 = vpack.c.bf16 %v1345_v3, %v1344_v2 }
 0x915   :  { %v3939_v37 = vpop.eup %3938 }
 0x916   :  { %v3941_v38 = vpop.eup %3940  ;;  %v1031_v39 = vsel %vm392_vm5, %v3939_v37, 0.0 }
 0x917   :  { %1032 = vadd.xlane.f32.xlu0 %v1031_v39  ;;  %v1028_v40 = vsel %vm392_vm5, %v3941_v38, 0.0  ;;  %v1343_v39 = vld [vmem:[%s4867_s28 + $0x28] sm:$0xff] }
 0x918   :  { %1029 = vadd.xlane.f32.xlu1 %v1028_v40 }
 0x929   :  { %3881 = vrot.lane.b32.xlu1 %v3880_v36, %s4845_s7  ;;  %v1341_v36 = vld [vmem:[%s4867_s28 + $0x18] sm:$0xff] }
 0x9a4   :  { %v1033_v42 = vpop.xlane.xlu0 %1032 }
 0x9a5   :  { %3942 = vrcp.f32 %v1033_v42  ;;  %v1030_v43 = vpop.xlane.xlu1 %1029 }
 0x9a6   :  { %3944 = vrcp.f32 %v1030_v43 }
 0x9a9   :  { %v3882_v44 = vpop.permute.xlu1 %3881 }
 0x9aa   :  { %v3884_v45 = vunpack.i.h.bf16 %v3882_v44  ;;  %v3883_v46 = vunpack.i.l.bf16 %v3882_v44 }
 0x9ac   :  { %v3706_v52 = vpack.c.bf16 %v3884_v45, %v3883_v46  ;;  %v3183_v46 = vld [vmem:[%s4820_s9] ss:$0 sm:$0xff] }
 0x9ae   :  { %3707 = vmatprep.subr.bf16.mxu1 %v3706_v52 }
 0x9af   :  { %v3943_v54 = vpop.eup %3942  ;;  %3709 = vmatpush3.bf16.msra.mxu1 %v3706_v52 }
 0x9b0   :  { %v3945_v61 = vpop.eup %3944  ;;  %v1037_v1 = vmul.f32 %v3943_v54, %v3939_v37  ;;  %v3730_v37 = vpack.c.bf16 %v1341_v36, %v1340_v33  ;;  %3727 = vmatprep.subr.bf16.mxu1 %v3726_v35 }
 0x9b1   :  { %v1036_v62 = vmul.f32 %v3945_v61, %v3941_v38  ;;  %v1342_v38 = vld [vmem:[%s4867_s28 + $0x20] sm:$0xff] }
 0x9b2   :  { %v3734_v40 = vpack.c.bf16 %v1343_v39, %v1342_v38  ;;  %v3189_v39 = vld [vmem:[%s4860_s8 + $0x1] ss:$0 sm:$0xff]  ;;  %s4869_s8 = smov 64  }
 0x9b3   :  { %3476 = vmatprep.mubr.msk.f32.mxu1 %vm392_vm5, %v1036_v62 }
 0x9b4   :  { %3477 = vmatmul.mubr.msk.f32.vlgmr.msra.gmra.mrb[4].mxu1 %vm392_vm5, %v1037_v1 }
 0x9b5   :  { %3729 = vmatpush3.bf16.msra.mxu1 %v3726_v35 }
 0x9b6   :  { %3731 = vmatprep.subr.bf16.mxu1 %v3730_v37 }
 0x9b9   :  { %3733 = vmatpush3.bf16.msra.mxu1 %v3730_v37 }
 0x9ba   :  { %3735 = vmatprep.subr.bf16.mxu1 %v3734_v40 }
 0x9bd   :  { %3737 = vmatpush3.bf16.msra.mxu1 %v3734_v40 }
 0x9be   :  { %3739 = vmatprep.subr.bf16.mxu1 %v3738_v4 }
 0x9c1   :  { %3741 = vmatpush3.bf16.msra.mxu1 %v3738_v4 }
 0xa87   :  { %v3478_v5 = vpop.f32.mrb[4].mxu1 }
 0xa88   :  { %v3839_v7 = vadd.f32 %v3478_v5, %v4319_v55  ;;  %v1128_v51 = vpop.f32.mrb[5].mxu1 }
 0xa89   :  { %v3840_v9 = vadd.f32 %v1128_v51, %v4321_v56 }
 0xa8b   :  { %3487 = vmatprep.mubr.msk.f32.mxu0 %vm188_vm3, %v3840_v9 }
 0xa8c   :  { %3488 = vmatmul.mubr.msk.f32.vlgmr.msra.gmra.mrb[8].mxu0 %vm188_vm3, %v3839_v7 }
 0xb5f   :  { %v3489_v11 = vpop.f32.mrb[8].mxu0 }
 0xb60   :  { %v4417_v12 = vadd.f32 %v3489_v11, %v4166_v22  ;;  %v1215_v13 = vpop.f32.mrb[9].mxu0  ;;  %v1251_v22 = vld [vmem:[%s4866_s0] sm:$0xff] }
 0xb61   :  { %v4420_v14 = vadd.f32 %v1215_v13, %v4168_v23  ;;  %v1252_v23 = vld [vmem:[%s4866_s0 + $0x8] sm:$0xff] }
 0xb62   :  { %v1228_v56 = vmul.f32 %v4417_v12, %v4417_v12  ;;  %v3718_v24 = vpack.c.bf16 %v1252_v23, %v1251_v22 }
 0xb63   :  { %v1227_v19 = vmul.f32 %v4420_v14, %v4420_v14 }
 0xb64   :  { %v1232_v58 = vsel %vm188_vm3, %v1228_v56, 0.0  ;;  %3719 = vmatprep.subr.bf16.mxu0 %v3718_v24 }
 0xb65   :  { %v1229_v55 = vsel %vm188_vm3, %v1227_v19, 0.0  ;;  %3721 = vmatpush3.bf16.msra.mxu0 %v3718_v24  ;;  %v3192_v24 = vld [vmem:[%s4859_s30 + $0x30] sm:$0xff] }
 0xb66   :  { %1230 = vadd.xlane.f32.xlu0 %v1229_v55  ;;  %3723 = vmatprep.subr.bf16.mxu0 %v3722_v27 }
 0xb69   :  { %3725 = vmatpush3.bf16.msra.mxu0 %v3722_v27  ;;  %v3746_v27 = vpack.c.bf16 %v3193_v25, %v3192_v24 }
 0xb6a   :  { %1233 = vadd.xlane.f32.xlu0 %v1232_v58 }
 0xbf3   :  { %v1231_v49 = vpop.xlane.xlu0 %1230 }
 0xbf4   :  { %v1235_v41 = vmul.f32 0.03125, %v1231_v49 }
 0xbf6   :  { %v1237_v50 = vadd.f32 1e-06, %v1235_v41 }
 0xbf7   :  { %v1234_v42 = vpop.xlane.xlu0 %1233 }
 0xbf8   :  { %3946 = vrsqrt.f32 %v1237_v50  ;;  %v1236_v43 = vmul.f32 0.03125, %v1234_v42 }
 0xbfa   :  { %v1238_v44 = vadd.f32 1e-06, %v1236_v43 }
 0xbfc   :  { %3948 = vrsqrt.f32 %v1238_v44 }
 0xc02   :  { %v3947_v45 = vpop.eup %3946 }
 0xc03   :  { %v1241_v52 = vmul.f32 %v3947_v45, %v4420_v14 }
 0xc05   :  { %v1249_v54 = vmul.f32 %v3183_v46, %v1241_v52 }
 0xc06   :  { %v3949_v61 = vpop.eup %3948 }
 0xc07   :  { %v1242_v62 = vmul.f32 %v3949_v61, %v4417_v12  ;;  %3498 = vmatprep.mubr.msk.f32.mxu0 %vm188_vm3, %v1249_v54 }
 0xc09   :  { %v1250_v1 = vmul.f32 %v3183_v46, %v1242_v62 }
 0xc0b   :  { %3499 = vmatmul.mubr.msk.f32.vlgmr.msra.gmra.mrb[10].mxu0 %vm188_vm3, %v1250_v1 }
 0xcde   :  { %v3500_v5 = vpop.f32.mrb[10].mxu0 }
 0xcdf   :  { %v1327_v7 = vpop.f32.mrb[11].mxu0  ;;  %v1337_v9 = vmax.f32 %v3500_v5, 0.0 }
 0xce0   :  { %v1336_v51 = vmax.f32 %v1327_v7, 0.0 }
 0xce2   :  { %3517 = vmatprep.mubr.msk.f32.mxu1 %vm101_vm0, %v1336_v51 }
 0xce3   :  { %3518 = vmatmul.mubr.msk.f32.vlgmr.msra.gmra.mrb[8].mxu1 %vm101_vm0, %v1337_v9 }
 0xdb6   :  { %v3519_v11 = vpop.f32.mrb[8].mxu1 }
 0xdb7   :  { %v1418_v13 = vpop.f32.mrb[9].mxu1  ;;  %v4474_v19 = vadd.f32 %v3519_v11, %v4417_v12  ;;  %v3190_v12 = vld [vmem:[%s4859_s30 + $0x20] sm:$0xff] }
 0xdb8   :  { %v4477_v55 = vadd.f32 %v1418_v13, %v4420_v14  ;;  %v3191_v14 = vld [vmem:[%s4859_s30 + $0x28] sm:$0xff]  ;;  %s4868_s30 = smov 96  }
 0xdb9   :  { %v1432_v22 = vmul.f32 %v4474_v19, %v4474_v19  ;;  %v3742_v20 = vpack.c.bf16 %v3191_v14, %v3190_v12 }
 0xdba   :  { %v1431_v56 = vmul.f32 %v4477_v55, %v4477_v55 }
 0xdbb   :  { %v1436_v23 = vsel %vm188_vm3, %v1432_v22, 0.0  ;;  %3743 = vmatprep.subr.bf16.mxu0 %v3742_v20 }
 0xdbc   :  { %v1433_v58 = vsel %vm188_vm3, %v1431_v56, 0.0  ;;  %3745 = vmatpush3.bf16.msra.mxu0 %v3742_v20 }
 0xdbd   :  { %1434 = vadd.xlane.f32.xlu0 %v1433_v58  ;;  %3747 = vmatprep.subr.bf16.mxu0 %v3746_v27 }
 0xdc0   :  { %3749 = vmatpush3.bf16.msra.mxu0 %v3746_v27 }
 0xdc1   :  { %1437 = vadd.xlane.f32.xlu0 %v1436_v23 }
 0xe4a   :  { %v1435_v29 = vpop.xlane.xlu0 %1434 }
 0xe4b   :  { %v1439_v30 = vmul.f32 0.03125, %v1435_v29 }
 0xe4d   :  { %v1441_v33 = vadd.f32 1e-06, %v1439_v30 }
 0xe4e   :  { %v1438_v35 = vpop.xlane.xlu0 %1437 }
 0xe4f   :  { %3950 = vrsqrt.f32 %v1441_v33  ;;  %v1440_v36 = vmul.f32 0.03125, %v1438_v35 }
 0xe51   :  { %v1442_v37 = vadd.f32 1e-06, %v1440_v36 }
 0xe53   :  { %3952 = vrsqrt.f32 %v1442_v37 }
 0xe59   :  { %v3951_v38 = vpop.eup %3950 }
 0xe5a   :  { %v1445_v40 = vmul.f32 %v3951_v38, %v4477_v55 }
 0xe5c   :  { %v1453_v49 = vmul.f32 %v3189_v39, %v1445_v40 }
 0xe5d   :  { %v3953_v41 = vpop.eup %3952 }
 0xe5e   :  { %v1446_v50 = vmul.f32 %v3953_v41, %v4474_v19  ;;  %3528 = vmatprep.mubr.msk.f32.mxu0 %vm188_vm3, %v1453_v49 }
 0xe60   :  { %v1454_v42 = vmul.f32 %v3189_v39, %v1446_v50 }
 0xe62   :  { %3529 = vmatmul.mubr.msk.f32.vlgmr.msra.gmra.mrb[12].mxu0 %vm188_vm3, %v1454_v42 }
 0xf35   :  { %v3530_v43 = vpop.f32.mrb[12].mxu0 }
 0xf36   :  { %v1532_v44 = vpop.f32.mrb[13].mxu0  ;;  %v4510_v61 = vmul.f32 %v3530_v43, %v4274_v17  ;;  %v4518_v1 = vmul.f32 %v3530_v43, %v4342_v28  ;;  %v1944_v51 = vmul.f32 %v3530_v43, %v4314_v53 }
 0xf37   :  { %v3885_v45 = vpack.i.bf16 %v3530_v43, %v1532_v44  ;;  %v1541_v46 = vmul.f32 %v1532_v44, %v4198_v47  ;;  %v1658_v52 = vmul.f32 %v4203_v48, %v1532_v44  ;;  %v4507_v54 = vmul.f32 %v1532_v44, %v4272_v16 }
 0xf38   :  { %v4513_v62 = vmul.f32 %v1532_v44, %v4340_v26  ;;  %v4521_v47 = vmul.f32 %v1532_v44, %v4391_v34  ;;  %v4524_v48 = vmul.f32 %v3530_v43, %v4387_v31  ;;  %v4530_v17 = vmul.f32 %v1532_v44, %v4332_v10 }
 0xf39   :  { %3886 = vrot.lane.b32.xlu1 %v3885_v45, %s4868_s30  ;;  %3535 = vmatprep.mubr.msk.f32.mxu0 %vm188_vm3, %v1541_v46  ;;  %v3890_v16 = vpack.i.bf16 %v4510_v61, %v4507_v54  ;;  %v4533_v26 = vmul.f32 %v3530_v43, %v4334_v21  ;;  %v1542_v10 = vmul.f32 %v3530_v43, %v4241_v59 }
 0xf3a   :  { %3542 = vmatprep.mubr.msk.f32.mxu1 %vm188_vm3, %v1658_v52  ;;  %v3900_v28 = vpack.i.bf16 %v4518_v1, %v4513_v62  ;;  %v3905_v34 = vpack.i.bf16 %v4524_v48, %v4521_v47  ;;  %v1659_v21 = vmul.f32 %v3530_v43, %v4246_v60  ;;  %v1943_v7 = vmul.f32 %v4292_v32, %v1532_v44 }
 0xf3b   :  { %v3895_v31 = vpack.i.bf16 %v4533_v26, %v4530_v17  ;;  %v2141_v59 = vmul.f32 %v4362_v6, %v1532_v44  ;;  %v2142_v60 = vmul.f32 %v3530_v43, %v4374_v8 }
 0xfab   :  { %v3887_v2 = vpop.permute.xlu1 %3886 }
 0xfac   :  { %v3889_v3 = vunpack.i.h.bf16 %v3887_v2  ;;  %v3888_v4 = vunpack.i.l.bf16 %v3887_v2 }
 0xfae   :  { %v3750_v5 = vpack.c.bf16 %v3889_v3, %v3888_v4 }
 0xfb0   :  { %3752 = vmatprep.subr.msk.bf16.mxu0 %vm4220_vm4, %v3750_v5  ;;  %3758 = vmatprep.subr.msk.bf16.mxu1 %vm4220_vm4, %v3750_v5 }
 0xfb1   :  { %3755 = vmatpush3.bf16.xpose.msk.msra.mxu0 %vm4220_vm4, %v3750_v5  ;;  %3761 = vmatpush3.bf16.xpose.msk.msra.mxu1 %vm4220_vm4, %v3750_v5 }
 0xfb2   :  { %3772 = vmatprep.subr.msk.bf16.mxu1 %vm4220_vm4, %v3750_v5 }
 0xfb8   :  { %3536 = vmatmul.mubr.msk.f32.vlgmr.msra.gmra.mrb[14].mxu0 %vm188_vm3, %v1542_v10  ;;  %3543 = vmatmul.mubr.msk.f32.vlgmr.msra.gmra.mrb[10].mxu1 %vm188_vm3, %v1659_v21 }
 0xfb9   :  { %3775 = vmatpush3.bf16.xpose.msk.msra.mxu1 %vm4220_vm4, %v3750_v5  ;;  %3563 = vmatprep.mubr.msk.f32.mxu1 %vm188_vm3, %v1943_v7 }
 0xfba   :  { %3782 = vmatprep.subr.msk.bf16.mxu1 %vm4220_vm4, %v3750_v5 }
 0xfc0   :  { %3564 = vmatmul.mubr.msk.f32.vlgmr.msra.gmra.mrb[12].mxu1 %vm188_vm3, %v1944_v51 }
 0xfc1   :  { %3785 = vmatpush3.bf16.xpose.msk.msra.mxu1 %vm4220_vm4, %v3750_v5  ;;  %3577 = vmatprep.mubr.msk.f32.mxu1 %vm188_vm3, %v2141_v59 }
 0xfc8   :  { %3578 = vmatmul.mubr.msk.f32.vlgmr.msra.gmra.mrb[14].mxu1 %vm188_vm3, %v2142_v60 }
0x108b   :  { %v3537_v32 = vpop.f32.mrb[14].mxu0  ;;  %v3544_v9 = vpop.f32.mrb[10].mxu1 }
0x108c   :  { %v1738_v11 = vadd.f32 %v3544_v9, %v4257_v63  ;;  %v1625_v13 = vpop.f32.mrb[15].mxu0  ;;  %v1732_v56 = vpop.f32.mrb[11].mxu1  ;;  %v1631_v8 = vadd.f32 %v3537_v32, %v4257_v63 }
0x108d   :  { %v1733_v53 = vadd.f32 %v1732_v56, %v4262_v0  ;;  %v1626_v58 = vadd.f32 %v1625_v13, %v4262_v0 }
0x108e   :  { %v1744_v6 = vsel %vm392_vm5, %v1738_v11, -inf  ;;  %v1637_v20 = vsel %vm392_vm5, %v1631_v8, -inf }
0x108f   :  { %1745 = vmax.xlane.f32.xlu1 %v1744_v6  ;;  %v1741_v57 = vsel %vm392_vm5, %v1733_v53, -inf  ;;  %v1634_v23 = vsel %vm392_vm5, %v1626_v58, -inf }
0x1090   :  { %1742 = vmax.xlane.f32.xlu0 %v1741_v57 }
0x1093   :  { %v3565_v22 = vpop.f32.mrb[12].mxu1 }
0x1094   :  { %v2017_v12 = vpop.f32.mrb[13].mxu1  ;;  %1635 = vmax.xlane.f32.xlu0 %v1634_v23  ;;  %v2023_v24 = vadd.f32 %v3565_v22, %v4257_v63 }
0x1095   :  { %v2018_v14 = vadd.f32 %v2017_v12, %v4262_v0 }
0x1096   :  { %v2029_v33 = vsel %vm392_vm5, %v2023_v24, -inf }
0x1097   :  { %v2026_v27 = vsel %vm392_vm5, %v2018_v14, -inf }
0x1098   :  { %1638 = vmax.xlane.f32.xlu0 %v1637_v20 }
0x109b   :  { %v3579_v25 = vpop.f32.mrb[14].mxu1 }
0x109c   :  { %v2215_v29 = vpop.f32.mrb[15].mxu1  ;;  %2027 = vmax.xlane.f32.xlu0 %v2026_v27  ;;  %v2221_v35 = vadd.f32 %v3579_v25, %v4257_v63 }
0x109d   :  { %v2216_v30 = vadd.f32 %v2215_v29, %v4262_v0 }
0x109e   :  { %v2227_v37 = vsel %vm392_vm5, %v2221_v35, -inf }
0x109f   :  { %v2224_v36 = vsel %vm392_vm5, %v2216_v30, -inf }
0x10a0   :  { %2030 = vmax.xlane.f32.xlu0 %v2029_v33 }
0x10a4   :  { %2225 = vmax.xlane.f32.xlu0 %v2224_v36 }
0x10a8   :  { %2228 = vmax.xlane.f32.xlu0 %v2227_v37 }
0x10be   :  { %3891 = vrot.lane.b32.xlu0 %v3890_v16, %s4869_s8 }
0x111c   :  { %v1746_v38 = vpop.xlane.xlu1 %1745 }
0x111d   :  { %v1748_v39 = vsub.f32 %v1738_v11, %v1746_v38  ;;  %v1743_v40 = vpop.xlane.xlu0 %1742 }
0x111e   :  { %v1747_v49 = vsub.f32 %v1733_v53, %v1743_v40 }
0x111f   :  { %v1751_v41 = vmul.f32 1.442695, %v1748_v39 }
0x1120   :  { %v1749_v50 = vmul.f32 1.442695, %v1747_v49 }
0x1121   :  { %3954 = vpow2.f32 %v1751_v41  ;;  %v1636_v0 = vpop.xlane.xlu0 %1635 }
0x1122   :  { %v1640_v42 = vsub.f32 %v1626_v58, %v1636_v0  ;;  %3956 = vpow2.f32 %v1749_v50 }
0x1124   :  { %v1642_v43 = vmul.f32 1.442695, %v1640_v42 }
0x1125   :  { %v1639_v63 = vpop.xlane.xlu0 %1638 }
0x1126   :  { %v1641_v44 = vsub.f32 %v1631_v8, %v1639_v63  ;;  %3958 = vpow2.f32 %v1642_v43 }
0x1128   :  { %v1644_v45 = vmul.f32 1.442695, %v1641_v44 }
0x1129   :  { %v2028_v46 = vpop.xlane.xlu0 %2027 }
0x112a   :  { %3960 = vpow2.f32 %v1644_v45  ;;  %v2032_v52 = vsub.f32 %v2018_v14, %v2028_v46 }
0x112b   :  { %v3955_v54 = vpop.eup %3954 }
0x112c   :  { %v2034_v61 = vmul.f32 1.442695, %v2032_v52  ;;  %v1756_v16 = vsel %vm392_vm5, %v3955_v54, 0.0  ;;  %v3957_v2 = vpop.eup %3956 }
0x112d   :  { %1757 = vadd.xlane.f32.xlu0 %v1756_v16  ;;  %v2031_v3 = vpop.xlane.xlu0 %2030  ;;  %v1753_v10 = vsel %vm392_vm5, %v3957_v2, 0.0  ;;  %v3221_v16 = vld [vmem:[%s4865_s27 + $0x28] sm:$0xff] }
0x112e   :  { %3962 = vpow2.f32 %v2034_v61  ;;  %v2033_v4 = vsub.f32 %v2023_v24, %v2031_v3  ;;  %v3220_v61 = vld [vmem:[%s4865_s27 + $0x20] sm:$0xff] }
0x1130   :  { %v2036_v5 = vmul.f32 1.442695, %v2033_v4  ;;  %v3959_v21 = vpop.eup %3958  ;;  %v3790_v4 = vpack.c.bf16 %v3221_v16, %v3220_v61 }
0x1131   :  { %1754 = vadd.xlane.f32.xlu0 %v1753_v10  ;;  %v2226_v7 = vpop.xlane.xlu0 %2225  ;;  %v1646_v60 = vsel %vm392_vm5, %v3959_v21, 0.0 }
0x1132   :  { %3964 = vpow2.f32 %v2036_v5  ;;  %v2230_v59 = vsub.f32 %v2216_v30, %v2226_v7  ;;  %v3223_v7 = vld [vmem:[%s4865_s27 + $0x38] sm:$0xff] }
0x1134   :  { %v4588_v51 = vpop.eup %3960  ;;  %v2232_v56 = vmul.f32 1.442695, %v2230_v59 }
0x1135   :  { %1647 = vadd.xlane.f32.xlu0 %v1646_v60  ;;  %v2229_v32 = vpop.xlane.xlu0 %2228  ;;  %v1649_v9 = vsel %vm392_vm5, %v4588_v51, 0.0 }
0x1136   :  { %v2231_v11 = vsub.f32 %v2221_v35, %v2229_v32  ;;  %1650 = vadd.xlane.f32.xlu1 %v1649_v9 }
0x1138   :  { %v4593_v13 = vpop.eup %3962  ;;  %v2234_v53 = vmul.f32 1.442695, %v2231_v11 }
0x1139   :  { %v3892_v6 = vpop.permute.xlu0 %3891  ;;  %v2038_v58 = vsel %vm392_vm5, %v4593_v13, 0.0 }
0x113a   :  { %3966 = vpow2.f32 %v2234_v53  ;;  %v3894_v57 = vunpack.i.h.bf16 %v3892_v6  ;;  %v3893_v8 = vunpack.i.l.bf16 %v3892_v6  ;;  %2039 = vadd.xlane.f32.xlu0 %v2038_v58 }
0x113b   :  { %3968 = vpow2.f32 %v2232_v56 }
0x113c   :  { %v4597_v22 = vpop.eup %3964  ;;  %v3762_v23 = vpack.c.bf16 %v3894_v57, %v3893_v8  ;;  %v3230_v8 = vld [vmem:[%s4866_s0 + $0x30] sm:$0xff] }
0x113d   :  { %v2041_v12 = vsel %vm392_vm5, %v4597_v22, 0.0 }
0x113e   :  { %2042 = vadd.xlane.f32.xlu1 %v2041_v12  ;;  %3763 = vmatprep.subr.bf16.mxu0 %v3762_v23 }
0x113f   :  { %3765 = vmatpush3.bf16.msra.mxu0 %v3762_v23  ;;  %v3231_v23 = vld [vmem:[%s4866_s0 + $0x38] sm:$0xff] }
0x1140   :  { %v3802_v12 = vpack.c.bf16 %v3231_v23, %v3230_v8 }
0x1144   :  { %v4601_v14 = vpop.eup %3966 }
0x1145   :  { %v2239_v20 = vsel %vm392_vm5, %v4601_v14, 0.0  ;;  %v3969_v24 = vpop.eup %3968 }
0x1146   :  { %2240 = vadd.xlane.f32.xlu1 %v2239_v20  ;;  %v2236_v25 = vsel %vm392_vm5, %v3969_v24, 0.0  ;;  %v3235_v20 = vld [vmem:[%s4867_s28 + $0x48] sm:$0xff] }
0x114a   :  { %2237 = vadd.xlane.f32.xlu1 %v2236_v25 }
0x1150   :  { %3901 = vrot.lane.b32.xlu0 %v3900_v28, %s4869_s8 }
0x1154   :  { %3906 = vrot.lane.b32.xlu0 %v3905_v34, %s4869_s8 }
0x115b   :  { %3896 = vrot.lane.b32.xlu1 %v3895_v31, %s4869_s8 }
0x11ba   :  { %v1758_v27 = vpop.xlane.xlu0 %1757 }
0x11bb   :  { %3970 = vrcp.f32 %v1758_v27  ;;  %v3237_v27 = vld [vmem:[%s4867_s28 + $0x58] sm:$0xff] }
0x11be   :  { %v1755_v29 = vpop.xlane.xlu0 %1754 }
0x11bf   :  { %3972 = vrcp.f32 %v1755_v29 }
0x11c2   :  { %v1648_v30 = vpop.xlane.xlu0 %1647 }
0x11c3   :  { %3974 = vrcp.f32 %v1648_v30  ;;  %v1651_v28 = vpop.xlane.xlu1 %1650  ;;  %v3238_v30 = vld [vmem:[%s4867_s28 + $0x60] sm:$0xff] }
0x11c4   :  { %3976 = vrcp.f32 %v1651_v28 }
0x11c5   :  { %v3971_v33 = vpop.eup %3970 }
0x11c6   :  { %v1762_v1 = vmul.f32 %v3971_v33, %v3955_v54  ;;  %v3239_v33 = vld [vmem:[%s4867_s28 + $0x68] sm:$0xff] }
0x11c7   :  { %v2040_v17 = vpop.xlane.xlu0 %2039 }
0x11c8   :  { %3978 = vrcp.f32 %v2040_v17 }
0x11c9   :  { %v3973_v35 = vpop.eup %3972 }
0x11ca   :  { %v1761_v62 = vmul.f32 %v3973_v35, %v3957_v2  ;;  %v3814_v35 = vpack.c.bf16 %v3239_v33, %v3238_v30  ;;  %v2857_v30 = vld [vmem:[%s4825_s17 + $0x10] sm:$0xff] }
0x11cb   :  { %v2043_v34 = vpop.xlane.xlu1 %2042  ;;  %v3902_v31 = vpop.permute.xlu0 %3901 }
0x11cc   :  { %3549 = vmatprep.mubr.msk.f32.mxu0 %vm392_vm5, %v1761_v62  ;;  %v3904_v38 = vunpack.i.h.bf16 %v3902_v31  ;;  %v3903_v39 = vunpack.i.l.bf16 %v3902_v31  ;;  %3980 = vrcp.f32 %v2043_v34  ;;  %v3227_v31 = vld [vmem:[%s4820_s9 + $0x1] ss:$0 sm:$0xff] }
0x11cd   :  { %v3975_v47 = vpop.eup %3974  ;;  %3550 = vmatmul.mubr.msk.f32.vlgmr.msra.gmra.mrb[16].mxu0 %vm392_vm5, %v1762_v1 }
0x11ce   :  { %v1654_v48 = vmul.f32 %v3975_v47, %v3959_v21  ;;  %v3977_v0 = vpop.eup %3976  ;;  %v3776_v43 = vpack.c.bf16 %v3904_v38, %v3903_v39  ;;  %v3222_v21 = vld [vmem:[%s4865_s27 + $0x30] sm:$0xff] }
0x11cf   :  { %v3907_v41 = vpop.permute.xlu0 %3906  ;;  %v1655_v45 = vmul.f32 %v3977_v0, %v4588_v51  ;;  %v3794_v59 = vpack.c.bf16 %v3223_v7, %v3222_v21 }
0x11d0   :  { %3556 = vmatprep.mubr.msk.f32.mxu0 %vm392_vm5, %v1654_v48  ;;  %v3909_v63 = vunpack.i.h.bf16 %v3907_v41  ;;  %v3908_v44 = vunpack.i.l.bf16 %v3907_v41 }
0x11d2   :  { %v3979_v42 = vpop.eup %3978  ;;  %v3786_v52 = vpack.c.bf16 %v3909_v63, %v3908_v44 }
0x11d3   :  { %v2241_v26 = vpop.xlane.xlu1 %2240  ;;  %v2046_v46 = vmul.f32 %v3979_v42, %v4593_v13 }
0x11d6   :  { %v3981_v54 = vpop.eup %3980 }
0x11d7   :  { %v2238_v36 = vpop.xlane.xlu1 %2237  ;;  %v2047_v3 = vmul.f32 %v3981_v54, %v4597_v22 }
0x11d8   :  { %3982 = vrcp.f32 %v2238_v36 }
0x11d9   :  { %3984 = vrcp.f32 %v2241_v26 }
0x11db   :  { %v3897_v37 = vpop.permute.xlu1 %3896 }
0x11dc   :  { %v3899_v40 = vunpack.i.h.bf16 %v3897_v37  ;;  %v3898_v49 = vunpack.i.l.bf16 %v3897_v37 }
0x11de   :  { %v3766_v50 = vpack.c.bf16 %v3899_v40, %v3898_v49  ;;  %v3240_v40 = vld [vmem:[%s4867_s28 + $0x70] sm:$0xff]  ;;  %v3241_v49 = vld [vmem:[%s4867_s28 + $0x78] sm:$0xff] }
0x11df   :  { %v3818_v41 = vpack.c.bf16 %v3241_v49, %v3240_v40 }
0x11e0   :  { %3767 = vmatprep.subr.bf16.mxu0 %v3766_v50 }
0x11e1   :  { %3769 = vmatpush3.bf16.msra.mxu0 %v3766_v50 }
0x11e2   :  { %3777 = vmatprep.subr.bf16.mxu0 %v3776_v43  ;;  %v3983_v2 = vpop.eup %3982 }
0x11e3   :  { %v2244_v5 = vmul.f32 %v3983_v2, %v3969_v24  ;;  %v3985_v10 = vpop.eup %3984  ;;  %v3236_v24 = vld [vmem:[%s4867_s28 + $0x50] sm:$0xff]  ;;  %v4004_v2 = vmov 0.0|0.0  }
0x11e4   :  { %3557 = vmatmul.mubr.msk.f32.vlgmr.msra.gmra.mrb[16].mxu0 %vm392_vm5, %v1655_v45  ;;  %v2245_v51 = vmul.f32 %v3985_v10, %v4601_v14  ;;  %v3234_v14 = vld [vmem:[%s4867_s28 + $0x40] sm:$0xff]  ;;  %v3810_v29 = vpack.c.bf16 %v3237_v27, %v3236_v24 }
0x11e5   :  { %3779 = vmatpush3.bf16.msra.mxu0 %v3776_v43  ;;  %3570 = vmatprep.mubr.msk.f32.mxu0 %vm392_vm5, %v2046_v46  ;;  %v3806_v25 = vpack.c.bf16 %v3235_v20, %v3234_v14  ;;  %v2856_v14 = vld [vmem:[%s4825_s17 + $0x8] sm:$0xff]  ;;  %v2858_v20 = vld [vmem:[%s4825_s17 + $0x18] sm:$0xff]  ;;  %v2864_v24 = vld [vmem:[%s4824_s18] sm:$0x1f] }
0x11e6   :  { %3787 = vmatprep.subr.bf16.mxu0 %v3786_v52  ;;  %v2855_v27 = vld [vmem:[%s4825_s17] sm:$0xff] }
0x11e7   :  { %v3833_v33 = vpack.c.bf16 %v2857_v30, %v2855_v27 }
0x11ec   :  { %3571 = vmatmul.mubr.msk.f32.vlgmr.msra.gmra.mrb[16].mxu0 %vm392_vm5, %v2047_v3 }
0x11ed   :  { %3789 = vmatpush3.bf16.msra.mxu0 %v3786_v52  ;;  %3584 = vmatprep.mubr.msk.f32.mxu0 %vm392_vm5, %v2244_v5 }
0x11ee   :  { %3791 = vmatprep.subr.bf16.mxu0 %v3790_v4 }
0x11f4   :  { %3585 = vmatmul.mubr.msk.f32.vlgmr.msra.gmra.mrb[16].mxu0 %vm392_vm5, %v2245_v51 }
0x11f5   :  { %3793 = vmatpush3.bf16.msra.mxu0 %v3790_v4 }
0x11f6   :  { %3795 = vmatprep.subr.bf16.mxu0 %v3794_v59 }
0x11f9   :  { %3797 = vmatpush3.bf16.msra.mxu0 %v3794_v59  ;;  %v3244_v59 = vld [vmem:[%s4821_s12] ss:$0 sm:$0xff] }
0x11fa   :  { %3807 = vmatprep.subr.bf16.mxu0 %v3806_v25 }
0x12c7   :  { %v3586_v60 = vpop.f32.mrb[16].mxu0 }
0x12c8   :  { %v2328_v32 = vpop.f32.mrb[17].mxu0 }
0x12c9   :  { %3595 = vmatprep.mubr.msk.f32.mxu0 %vm188_vm3, %v2328_v32 }
0x12ca   :  { %3596 = vmatmul.mubr.msk.f32.vlgmr.msra.gmra.mrb[18].mxu0 %vm188_vm3, %v3586_v60 }
0x12cb   :  { %3809 = vmatpush3.bf16.msra.mxu0 %v3806_v25  ;;  %v3831_v25 = vpack.c.bf16 %v2858_v20, %v2856_v14 }
0x12cc   :  { %3811 = vmatprep.subr.bf16.mxu0 %v3810_v29 }
0x12cf   :  { %3813 = vmatpush3.bf16.msra.mxu0 %v3810_v29  ;;  %v2863_v29 = vld [vmem:[%s4826_s1] sm:$0x3] }
0x12d0   :  { %3815 = vmatprep.subr.bf16.mxu0 %v3814_v35 }
0x12d3   :  { %3817 = vmatpush3.bf16.msra.mxu0 %v3814_v35  ;;  %v2860_v35 = vld [vmem:[%s4825_s17 + $0x28] sm:$0xff] }
0x12d4   :  { %3819 = vmatprep.subr.bf16.mxu0 %v3818_v41 }
0x12d7   :  { %3821 = vmatpush3.bf16.msra.mxu0 %v3818_v41 }
0x139d   :  { %v3597_v9 = vpop.f32.mrb[18].mxu0 }
0x139e   :  { %v4645_v11 = vadd.f32 %v3597_v9, %v4474_v19  ;;  %v2416_v13 = vpop.f32.mrb[19].mxu0  ;;  %v3228_v19 = vld [vmem:[%s4866_s0 + $0x20] sm:$0xff] }
0x139f   :  { %v4648_v56 = vadd.f32 %v2416_v13, %v4477_v55  ;;  %v3229_v55 = vld [vmem:[%s4866_s0 + $0x28] sm:$0xff] }
0x13a0   :  { %v2430_v53 = vmul.f32 %v4645_v11, %v4645_v11  ;;  %v3798_v22 = vpack.c.bf16 %v3229_v55, %v3228_v19  ;;  %v2734_v19 = vld [vmem:[%s4822_s13 + $0x10] sm:$0xff]  ;;  %v2735_v55 = vld [vmem:[%s4822_s13 + $0x18] sm:$0xff] }
0x13a1   :  { %v2429_v6 = vmul.f32 %v4648_v56, %v4648_v56  ;;  %v3829_v8 = vpack.c.bf16 %v2735_v55, %v2734_v19 }
0x13a2   :  { %v2434_v58 = vsel %vm188_vm3, %v2430_v53, 0.0  ;;  %3799 = vmatprep.subr.bf16.mxu1 %v3798_v22  ;;  %v2733_v53 = vld [vmem:[%s4822_s13 + $0x8] sm:$0xff] }
0x13a3   :  { %2435 = vadd.xlane.f32.xlu0 %v2434_v58  ;;  %v2431_v57 = vsel %vm188_vm3, %v2429_v6, 0.0  ;;  %3801 = vmatpush3.bf16.msra.mxu1 %v3798_v22  ;;  %v2658_v58 = vld [vmem:[%s4823_s3] sm:$0x3] }
0x13a4   :  { %2432 = vadd.xlane.f32.xlu1 %v2431_v57  ;;  %3803 = vmatprep.subr.bf16.mxu1 %v3802_v12 }
0x13a7   :  { %3805 = vmatpush3.bf16.msra.mxu1 %v3802_v12  ;;  %v2865_v12 = vld [vmem:[%s4824_s18 + $0x8] sm:$0x1f] }
0x13a8   :  { %3822 = vmatprep.subr.bf16.mxu1 %v4004_v2 }
0x1430   :  { %v2436_v62 = vpop.xlane.xlu0 %2435 }
0x1431   :  { %v2438_v1 = vmul.f32 0.03125, %v2436_v62  ;;  %v2433_v28 = vpop.xlane.xlu1 %2432  ;;  %v2862_v62 = vld [vmem:[%s4825_s17 + $0x38] sm:$0xff] }
0x1432   :  { %v2437_v47 = vmul.f32 0.03125, %v2433_v28  ;;  %v2859_v28 = vld [vmem:[%s4825_s17 + $0x20] sm:$0xff] }
0x1433   :  { %v2440_v48 = vadd.f32 1e-06, %v2438_v1  ;;  %v3835_v1 = vpack.c.bf16 %v2862_v62, %v2860_v35 }
0x1434   :  { %v2439_v34 = vadd.f32 1e-06, %v2437_v47  ;;  %v2861_v47 = vld [vmem:[%s4825_s17 + $0x30] sm:$0xff] }
0x1435   :  { %3986 = vrsqrt.f32 %v2440_v48  ;;  %v3837_v48 = vpack.c.bf16 %v2861_v47, %v2859_v28 }
0x1436   :  { %3988 = vrsqrt.f32 %v2439_v34  ;;  %v3246_v34 = vld [vmem:[%s4827_s14] ss:$0 sm:$0xff] }
0x143f   :  { %v3987_v17 = vpop.eup %3986 }
0x1440   :  { %v3989_v26 = vpop.eup %3988  ;;  %v2444_v36 = vmul.f32 %v3987_v17, %v4645_v11 }
0x1441   :  { %v2443_v37 = vmul.f32 %v3989_v26, %v4648_v56 }
0x1442   :  { %v2452_v39 = vmul.f32 %v3227_v31, %v2444_v36 }
0x1443   :  { %v2451_v38 = vmul.f32 %v3227_v31, %v2443_v37 }
0x1445   :  { %3606 = vmatprep.mubr.msk.f32.mxu1 %vm188_vm3, %v2451_v38 }
0x1446   :  { %3607 = vmatmul.mubr.msk.f32.vlgmr.msra.gmra.mrb[16].mxu1 %vm188_vm3, %v2452_v39 }
0x1447   :  { %3632 = vmatprep.mubr.msk.f32.mxu1 %vm4005_vm6, %v4001_v18 }
0x1519   :  { %v3608_v50 = vpop.f32.mrb[16].mxu1 }
0x151a   :  { %v2530_v0 = vpop.f32.mrb[17].mxu1  ;;  %v2540_v43 = vmax.f32 %v3608_v50, 0.0 }
0x151b   :  { %v2539_v42 = vmax.f32 %v2530_v0, 0.0 }
0x151d   :  { %3625 = vmatprep.mubr.msk.f32.mxu0 %vm101_vm0, %v2539_v42 }
0x151e   :  { %3626 = vmatmul.mubr.msk.f32.vlgmr.msra.gmra.mrb[20].mxu0 %vm101_vm0, %v2540_v43 }
0x15f1   :  { %v3627_v63 = vpop.f32.mrb[20].mxu0 }
0x15f2   :  { %v2632_v44 = vadd.f32 %v3627_v63, %v4645_v11  ;;  %v2622_v45 = vpop.f32.mrb[21].mxu0 }
0x15f3   :  { %v2631_v46 = vadd.f32 %v2622_v45, %v4648_v56  ;;  %v2732_v56 = vld [vmem:[%s4822_s13] sm:$0xff] }
0x15f4   :  { %v2635_v52 = vmul.f32 %v2632_v44, %v2632_v44  ;;  %v3826_v57 = vpack.c.bf16 %v2733_v53, %v2732_v56 }
0x15f5   :  { %v2634_v54 = vmul.f32 %v2631_v46, %v2631_v46 }
0x15f6   :  { %v2639_v61 = vsel %vm188_vm3, %v2635_v52, 0.0 }
0x15f7   :  { %2640 = vadd.xlane.f32.xlu1 %v2639_v61  ;;  %v2636_v16 = vsel %vm188_vm3, %v2634_v54, 0.0 }
0x15f8   :  { %2637 = vadd.xlane.f32.xlu0 %v2636_v16 }
0x1684   :  { %v2641_v3 = vpop.xlane.xlu1 %2640 }
0x1685   :  { %v2643_v4 = vmul.f32 0.03125, %v2641_v3  ;;  %v2638_v5 = vpop.xlane.xlu0 %2637 }
0x1686   :  { %v2642_v10 = vmul.f32 0.03125, %v2638_v5 }
0x1687   :  { %v2645_v21 = vadd.f32 1e-06, %v2643_v4  ;;  %v3249_v4 = vld [vmem:[%s4829_s16] ss:$0 sm:$0xff] }
0x1688   :  { %v2644_v7 = vadd.f32 1e-06, %v2642_v10 }
0x1689   :  { %3990 = vrsqrt.f32 %v2645_v21  ;;  %v29_v21 = vstv %s4830_s23 }
0x168a   :  { %3992 = vrsqrt.f32 %v2644_v7  ;;  %30 = vst [vmem:[#allocation2] sm:$0x1] %v29_v21  ;;  %v3025_v7 = vshrl.u32 %v81_v15, 7 }
0x1693   :  { %v3991_v51 = vpop.eup %3990 }
0x1694   :  { %v3993_v60 = vpop.eup %3992  ;;  %v2649_v32 = vmul.f32 %v3991_v51, %v2632_v44  ;;  %v4778_v51 = vsub.s32 0, %v3025_v7 }
0x1695   :  { %v2648_v9 = vmul.f32 %v3993_v60, %v2631_v46  ;;  %v3022_v60 = vld [vmem:[%s4831_s19] sm:$0x3] }
0x1696   :  { %v2657_v11 = vmul.f32 %v3244_v59, %v2649_v32  ;;  %v3027_v32 = vrot.slane %v3022_v60, %v4778_v51 }
0x1697   :  { %v2656_v13 = vmul.f32 %v3244_v59, %v2648_v9  ;;  %v4780_v59 = vsub.s32 1, %v3025_v7 }
0x1699   :  { %v3823_v6 = vpack.c.bf16 %v2657_v11, %v2656_v13  ;;  %v3031_v9 = vrot.slane %v3022_v60, %v4780_v59 }
0x169b   :  { %3824 = vmatpush3.bf16.msra.mxu1 %v3823_v6 }
0x169c   :  { %3825 = vmatprep.subr.bf16.mxu1 %v4004_v2 }
0x169e   :  { %3633 = vmatmul.mubr.msk.f32.vlgmr.msra.gmra.mrb[18].mxu1 %vm392_vm5, %v2658_v58 }
0x169f   :  { %3827 = vmatpush3.bf16.msra.mxu1 %v3826_v57  ;;  %3643 = vmatprep.mubr.msk.f32.mxu1 %vm4005_vm6, %v4001_v18 }
0x16a0   :  { %3828 = vmatprep.subr.bf16.mxu1 %v4004_v2  ;;  %v3248_v2 = vld [vmem:[%s4828_s15] ss:$0 sm:$0xff] }
0x16a3   :  { %3830 = vmatpush3.bf16.msra.mxu1 %v3829_v8 }
0x16a4   :  { %3250 = vmatprep.subr.msk.mxu1 %vm2870_vm7, %v2865_v12 }
0x1771   :  { %v2728_v22 = vpop.f32.mrb[18].mxu1 }
0x1772   :  { %3644 = vmatmul.mubr.msk.f32.vlgmr.msra.gmra.mrb[20].mxu1 %vm188_vm3, %v2728_v22  ;;  %v3634_v23 = vpop.f32.mrb[19].mxu1 }
0x1773   :  { %2941 = vmatprep.mubr.f32.mxu1 %v4001_v18  ;;  %3251 = vmatpush1.msk.msra.mxu1 %vm2870_vm7, %v2864_v24 }
0x1774   :  { %3832 = vmatprep.subr.bf16.mxu1 %v3831_v25 }
0x1776   :  { %3252 = vmatmul.mubr.msk.f32.vlgmr.msra.gmra.mrb[22].mxu1 %vm2866_vm8, %v2863_v29 }
0x1777   :  { %3015 = vmatprep.mubr.f32.mxu1 %v4001_v18  ;;  %3834 = vmatpush1.bf16.msra.mxu1 %v3833_v33 }
0x1778   :  { %3836 = vmatprep.subr.bf16.mxu1 %v3835_v1 }
0x177b   :  { %3838 = vmatpush1.bf16.msra.mxu1 %v3837_v48 }
0x1845   :  { %v2812_v17 = vpop.f32.mrb[20].mxu1 }
0x1846   :  { %v2813_v18 = vadd.f32 %v3246_v34, %v2812_v17  ;;  %v3645_v26 = vpop.f32.mrb[21].mxu1 }
0x1848   :  { %v2817_v31 = vsel %vm2816_vm9, %v2813_v18, 0.0 }
0x1849   :  { %v2818_v36 = vrot.slane %v2817_v31, 4 }
0x184b   :  { %v2819_v37 = vadd.f32 %v2818_v36, %v2817_v31 }
0x184d   :  { %v2820_v38 = vrot.slane %v2819_v37, 2 }
0x184f   :  { %v2821_v39 = vadd.f32 %v2820_v38, %v2819_v37 }
0x1851   :  { %v2822_v40 = vrot.slane %v2821_v39, 1 }
0x1853   :  { %v2823_v49 = vadd.f32 %v2822_v40, %v2821_v39 }
0x1855   :  { %v2825_v41 = vmul.f32 0.5, %v2823_v49 }
0x1857   :  { %v2826_v50 = vsub.f32 %v2813_v18, %v2825_v41 }
0x1859   :  { %v2827_v0 = vmul.f32 %v2826_v50, %v2826_v50 }
0x185b   :  { %v2828_v42 = vsel %vm2816_vm9, %v2827_v0, 0.0 }
0x185c   :  { %v2829_v43 = vrot.slane %v2828_v42, 4 }
0x185e   :  { %v2830_v63 = vadd.f32 %v2829_v43, %v2828_v42  ;;  %v3079_v42 = vld [vmem:[%s4832_s20] sm:$0x3] }
0x185f   :  { %v3093_v43 = vld [vmem:[%s4833_s21] sm:$0x3] }
0x1860   :  { %v2831_v44 = vrot.slane %v2830_v63, 2 }
0x1862   :  { %v2832_v45 = vadd.f32 %v2831_v44, %v2830_v63  ;;  %v3084_v63 = vrot.slane %v3079_v42, %v4778_v51 }
0x1864   :  { %v2833_v46 = vrot.slane %v2832_v45, 1 }
0x1866   :  { %v2834_v52 = vadd.f32 %v2833_v46, %v2832_v45  ;;  %v3088_v45 = vrot.slane %v3079_v42, %v4780_v59 }
0x1868   :  { %v2835_v54 = vmul.f32 0.5, %v2834_v52 }
0x186a   :  { %v2836_v61 = vadd.f32 1e-05, %v2835_v54  ;;  %v3098_v54 = vrot.slane %v3093_v43, %v4778_v51 }
0x186c   :  { %3994 = vrsqrt.f32 %v2836_v61 }
0x1876   :  { %v3995_v16 = vpop.eup %3994 }
0x1877   :  { %v2838_v3 = vmul.f32 %v3995_v16, %v2826_v50  ;;  %v3102_v16 = vrot.slane %v3093_v43, %v4780_v59 }
0x1879   :  { %v2846_v5 = vmul.f32 %v3248_v2, %v2838_v3  ;;  %v3113_v3 = vld [vmem:[%s4834_s22] sm:$0x3] }
0x187a   :  { %v3118_v21 = vrot.slane %v3113_v3, %v4778_v51  ;;  %v3122_v60 = vrot.slane %v3113_v3, %v4780_v59 }
0x187b   :  { %v2854_v10 = vadd.f32 %v3249_v4, %v2846_v5 }
0x187d   :  { %3253 = vmatmul.mubr.msk.f32.vlgmr.msra.gmra.mrb[22].mxu1 %vm188_vm3, %v2854_v10 }
0x1950   :  { %v3017_v11 = vpop.f32.mrb[22].mxu1 }
0x1951   :  { %v3034_v13 = vadd.f32 %v3027_v32, %v3017_v11  ;;  %v3019_v56 = vpop.f32.mrb[23].mxu1 }
0x1952   :  { %v3035_v53 = vadd.f32 %v3031_v9, %v3019_v56 }
0x1953   :  { %v3037_v6 = vsel %vm3036_vm10, %v3034_v13, 0.0 }
0x1954   :  { %v3038_v15 = vrot.slane %v3037_v6, 4  ;;  %v3044_v58 = vsel %vm3036_vm10, %v3035_v53, 0.0 }
0x1955   :  { %v3045_v57 = vrot.slane %v3044_v58, 4 }
0x1956   :  { %v3039_v19 = vadd.f32 %v3038_v15, %v3037_v6 }
0x1957   :  { %v3046_v55 = vadd.f32 %v3045_v57, %v3044_v58  ;;  %v3254_v58 = vld [vmem:[#allocation2] ss:$0 sm:$0xff] }
0x1958   :  { %v3040_v8 = vrot.slane %v3039_v19, 2 }
0x1959   :  { %v3047_v22 = vrot.slane %v3046_v55, 2 }
0x195a   :  { %v3041_v23 = vadd.f32 %v3040_v8, %v3039_v19 }
0x195b   :  { %v3048_v12 = vadd.f32 %v3047_v22, %v3046_v55 }
0x195c   :  { %v3042_v14 = vrot.slane %v3041_v23, 1 }
0x195d   :  { %v3049_v20 = vrot.slane %v3048_v12, 1 }
0x195e   :  { %v3043_v24 = vadd.f32 %v3042_v14, %v3041_v23 }
0x195f   :  { %v3050_v25 = vadd.f32 %v3049_v20, %v3048_v12 }
0x1960   :  { %v3051_v27 = vmul.f32 0.5, %v3043_v24 }
0x1961   :  { %v3052_v29 = vmul.f32 0.5, %v3050_v25 }
0x1962   :  { %v3053_v30 = vsub.f32 %v3034_v13, %v3051_v27 }
0x1963   :  { %v3054_v33 = vsub.f32 %v3035_v53, %v3052_v29 }
0x1964   :  { %v3055_v35 = vmul.f32 %v3053_v30, %v3053_v30 }
0x1965   :  { %v3056_v62 = vmul.f32 %v3054_v33, %v3054_v33 }
0x1966   :  { %v3057_v1 = vsel %vm3036_vm10, %v3055_v35, 0.0 }
0x1967   :  { %v3058_v28 = vrot.slane %v3057_v1, 4  ;;  %v3064_v47 = vsel %vm3036_vm10, %v3056_v62, 0.0 }
0x1968   :  { %v3065_v48 = vrot.slane %v3064_v47, 4 }
0x1969   :  { %v3059_v34 = vadd.f32 %v3058_v28, %v3057_v1 }
0x196a   :  { %v3066_v17 = vadd.f32 %v3065_v48, %v3064_v47 }
0x196b   :  { %v3060_v18 = vrot.slane %v3059_v34, 2 }
0x196c   :  { %v3067_v26 = vrot.slane %v3066_v17, 2 }
0x196d   :  { %v3061_v31 = vadd.f32 %v3060_v18, %v3059_v34 }
0x196e   :  { %v3068_v36 = vadd.f32 %v3067_v26, %v3066_v17 }
0x196f   :  { %v3062_v37 = vrot.slane %v3061_v31, 1 }
0x1970   :  { %v3069_v38 = vrot.slane %v3068_v36, 1 }
0x1971   :  { %v3063_v39 = vadd.f32 %v3062_v37, %v3061_v31 }
0x1972   :  { %v3070_v40 = vadd.f32 %v3069_v38, %v3068_v36 }
0x1973   :  { %v3071_v49 = vmul.f32 0.5, %v3063_v39 }
0x1974   :  { %v3072_v41 = vmul.f32 0.5, %v3070_v40 }
0x1975   :  { %v3073_v50 = vadd.f32 1e-05, %v3071_v49 }
0x1976   :  { %v3074_v0 = vadd.f32 1e-05, %v3072_v41 }
0x1977   :  { %3996 = vrsqrt.f32 %v3073_v50 }
0x1978   :  { %3998 = vrsqrt.f32 %v3074_v0 }
0x1981   :  { %v3997_v44 = vpop.eup %3996 }
0x1982   :  { %v3999_v46 = vpop.eup %3998  ;;  %v3077_v52 = vmul.f32 %v3997_v44, %v3053_v30 }
0x1983   :  { %v3078_v61 = vmul.f32 %v3999_v46, %v3054_v33 }
0x1984   :  { %v3091_v2 = vmul.f32 %v3084_v63, %v3077_v52 }
0x1985   :  { %v3092_v4 = vmul.f32 %v3088_v45, %v3078_v61 }
0x1986   :  { %v3105_v5 = vadd.f32 %v3098_v54, %v3091_v2 }
0x1987   :  { %v3106_v10 = vadd.f32 %v3102_v16, %v3092_v4 }
0x1988   :  { %vm3107_vm11 = vcmp.ge.f32.partialorder %v3105_v5, 0.0  ;;  %v3109_v7 = vmul.f32 0.2, %v3105_v5 }
0x1989   :  { %vm3108_vm12 = vcmp.ge.f32.partialorder %v3106_v10, 0.0  ;;  %v3110_v32 = vmul.f32 0.2, %v3106_v10 }
0x198a   :  { %v3111_v9 = vsel %vm3107_vm11, %v3105_v5, %v3109_v7 }
0x198b   :  { %v3112_v11 = vsel %vm3108_vm12, %v3106_v10, %v3110_v32  ;;  %v3125_v13 = vmul.f32 %v3118_v21, %v3111_v9 }
0x198c   :  { %v3126_v56 = vmul.f32 %v3122_v60, %v3112_v11 }
0x198d   :  { %v3127_v53 = vsel %vm3036_vm10, %v3125_v13, 0.0 }
0x198e   :  { %v3128_v6 = vsel %vm3036_vm10, %v3126_v56, 0.0 }
0x198f   :  { %v3129_v15 = vadd.f32 %v3128_v6, %v3127_v53 }
0x1991   :  { %3130 = vadd.xlane.f32.xlu0 %v3129_v15 }
0x1a1e   :  { %v3131_v57 = vpop.xlane.xlu0 %3130 }
0x1a1f   :  { %v3139_v51 = vadd.f32 %v3254_v58, %v3131_v57 }
0x1a21   :  { %3141 = vst.msk [vmem:[%s4835_s24] sm:$0x3] %vm3140_vm13, %v3139_v51 }

</bundles_post_ra>
